<compile_context>
chip_gen: v7x
topology: tpu7x:2x2x1
jax: 0.10.0
libtpu: 0.0.40
codegen_flags: <defaults>
</compile_context>

<pallas_src>
import functools

import jax
import jax.numpy as jnp
from jax import lax
from jax.experimental import pallas as pl
from jax.experimental.pallas import tpu as pltpu


def _round_up(x, m):
    return ((x + m - 1) // m) * m


def _full_spec(shape):
    # Full-array resident block (constant index_map across the 1-D grid).
    return pl.BlockSpec(shape, lambda i: (0,) * len(shape))


# ----------------------------------------------------------------------------
# Single fused kernel:
#   conv (im2col matmul, per-image chunks) + bias + ReLU + global-avg-pool
#   -> [last step] encoder fc -> proj Linear+BN+ReLU -> proj Linear
#                  -> pred Linear+BN+ReLU -> pred Linear
# ----------------------------------------------------------------------------
def _byol_fused_kernel(
    p_ref, w_ref, b_ref,                      # conv: patches tile, weight, bias
    enc_w, enc_b,                             # encoder fc
    pw1, pb1, pg1, pbe1, pw2, pb2,            # projection head
    qw1, qb1, qg1, qbe1, qw2, qb2,            # prediction head
    o_ref,                                    # (B_pad, P_pad) final output
    acc_ref,                                  # (n_tiles, ipt, F_pad) pooled scratch
    *, hw, images_per_tile, n_tiles, n_valid):
    inv_hw = 1.0 / hw

    # Hoist resident conv operands out of the per-image chunk loop.
    w = w_ref[...]                            # (K_pad, F_pad) bf16
    bias = b_ref[...]                         # (1, F_pad) f32

    # Per-image chunks: matmul -> bias+ReLU -> row-sum (XLU/VPU), keeping the
    # live f32 intermediate at (HW, F_pad) instead of (TILE_M, F_pad).
    pooled_rows = []
    for j in range(images_per_tile):          # small static unroll
        rows = p_ref[pl.ds(j * hw, hw), :]    # (HW, K_pad) bf16, static slice
        hj = jnp.dot(rows, w, preferred_element_type=jnp.float32)
        hj = jnp.maximum(hj + bias, 0.0)
        pooled_rows.append(jnp.sum(hj, axis=0, keepdims=True) * inv_hw)  # (1, F_pad)

    # This tile covers images [i*ipt, (i+1)*ipt); store them into the resident
    # accumulator via a dynamic leading-dim index (well-supported store form).
    acc_ref[pl.program_id(0)] = jnp.concatenate(pooled_rows, axis=0)     # (ipt, F_pad)

    # ---- last grid step: run the whole post-pool MLP chain in VMEM ----------
    @pl.when(pl.program_id(0) == pl.num_programs(0) - 1)
    def _finish():
        pooled = jnp.concatenate([acc_ref[t] for t in range(n_tiles)], axis=0)
        b_pad = pooled.shape[0]

        row_ids = lax.broadcasted_iota(jnp.int32, (b_pad, 1), 0)
        mask = (row_ids < n_valid).astype(jnp.float32)
        inv_n = 1.0 / n_valid

        def linear(x_f32, w_r, b_r):
            # bf16 MXU inputs, f32 accumulation, f32 bias add.
            return jnp.dot(x_f32.astype(jnp.bfloat16), w_r[...],
                           preferred_element_type=jnp.float32) + b_r[...]

        def bn_relu(h, g_r, be_r):
            # BatchNorm1d train-mode batch stats (biased var, eps=1e-5) over
            # the real batch rows only (padded rows masked out of the stats).
            mu = jnp.sum(h * mask, axis=0, keepdims=True) * inv_n
            d = h - mu
            var = jnp.sum(d * d * mask, axis=0, keepdims=True) * inv_n
            y = d * lax.rsqrt(var + 1e-5) * g_r[...] + be_r[...]
            return jnp.maximum(y, 0.0)

        h = linear(pooled, enc_w, enc_b)              # encoder fc (flatten is identity)
        h = bn_relu(linear(h, pw1, pb1), pg1, pbe1)   # projection: Linear + BN + ReLU
        h = linear(h, pw2, pb2)                       # projection: Linear
        h = bn_relu(linear(h, qw1, qb1), qg1, qbe1)   # prediction: Linear + BN + ReLU
        h = linear(h, qw2, qb2)                       # prediction: Linear
        o_ref[...] = h


# ----------------------------------------------------------------------------
# JAX glue: im2col for 3x3 / stride-1 / padding-1 conv (NCHW), built in bf16
# ----------------------------------------------------------------------------
def _im2col_3x3_same_bf16(x):
    # x: (B, C, H, W) -> patches (B*H*W, C*9) bf16; column order matches a
    # (F, C, 3, 3) torch conv weight flattened to (C*9, F).
    B, C, H, W = x.shape
    xp = jnp.pad(x.astype(jnp.bfloat16), ((0, 0), (0, 0), (1, 1), (1, 1)))
    cols = [xp[:, :, ki:ki + H, kj:kj + W] for ki in range(3) for kj in range(3)]
    p = jnp.stack(cols, axis=2)                    # (B, C, 9, H, W)
    p = p.reshape(B, C * 9, H * W)
    p = p.transpose(0, 2, 1).reshape(B * H * W, C * 9)
    return p


# ----------------------------------------------------------------------------
# BYOLOnlineNetwork forward
# ----------------------------------------------------------------------------
def byol_online_forward(pp, x, *, proj_dim):
    B, C, H, W = x.shape
    HW = H * W
    assert HW % 8 == 0, "per-image row count must be sublane-aligned"

    K_pad, F_pad = pp["conv_w"].shape
    E_pad = pp["enc_fc_w"].shape[1]
    H_pad = pp["proj_w1"].shape[1]
    P_pad = pp["pred_w2"].shape[1]
    B_pad = _round_up(B, 8)
    M_pad = B_pad * HW

    # images-per-tile: largest divisor of B_pad whose row-tile stays <= ~1024
    # rows (v7x-safe patch buffers; trivially fits v5e/v6e VMEM).  TILE_M is a
    # multiple of HW so every image's rows land in exactly one tile (required
    # by the in-kernel reshape-free per-image pooling).
    max_tile_rows = max(HW, 1024)
    ipt = 1
    for d in range(1, B_pad + 1):
        if B_pad % d == 0 and d * HW <= max_tile_rows:
            ipt = d
    tile_m = ipt * HW
    n_tiles = B_pad // ipt

    # im2col in bf16, zero-padded (rows B*HW..M_pad, cols C*9..K_pad) in one pass.
    patches = _im2col_3x3_same_bf16(x)                                 # (B*HW, C*9)
    patches = jnp.pad(patches, ((0, M_pad - B * HW), (0, K_pad - C * 9)))

    args = (patches, pp["conv_w"], pp["conv_b"],
            pp["enc_fc_w"], pp["enc_fc_b"],
            pp["proj_w1"], pp["proj_b1"], pp["proj_g1"], pp["proj_be1"],
            pp["proj_w2"], pp["proj_b2"],
            pp["pred_w1"], pp["pred_b1"], pp["pred_g1"], pp["pred_be1"],
            pp["pred_w2"], pp["pred_b2"])

    in_specs = [pl.BlockSpec((tile_m, K_pad), lambda i: (i, 0))]        # patches tile
    in_specs += [_full_spec(a.shape) for a in args[1:]]                 # residents

    flops = (2 * M_pad * K_pad * F_pad
             + 2 * B_pad * (F_pad * E_pad + E_pad * H_pad + H_pad * P_pad
                            + P_pad * H_pad + H_pad * P_pad))
    bytes_accessed = (int(patches.size) * 2
                      + sum(int(a.size) * a.dtype.itemsize for a in args[1:])
                      + B_pad * P_pad * 4)
    ce = pl.CostEstimate(flops=flops, transcendentals=2 * H_pad,
                         bytes_accessed=bytes_accessed)

    kernel = functools.partial(_byol_fused_kernel, hw=HW, images_per_tile=ipt,
                               n_tiles=n_tiles, n_valid=B)

    out = pl.pallas_call(
        kernel,
        out_shape=jax.ShapeDtypeStruct((B_pad, P_pad), jnp.float32),
        grid_spec=pltpu.PrefetchScalarGridSpec(
            num_scalar_prefetch=0,
            grid=(n_tiles,),
            in_specs=in_specs,
            out_specs=pl.BlockSpec((B_pad, P_pad), lambda i: (0, 0)),
            scratch_shapes=[pltpu.VMEM((n_tiles, ipt, F_pad), jnp.float32)],
        ),
        compiler_params=pltpu.CompilerParams(
            # Row-tile axis carries the pooled accumulator => reduction axis.
            # (Default scoped VMEM limit is ample: kernel footprint < 2 MiB.)
            dimension_semantics=("arbitrary",),
        ),
        cost_estimate=ce,
    )(*args)

    return out[:B, :proj_dim]


# ----------------------------------------------------------------------------
# Parameters: torch-shaped init, then zero-padded to 128-multiples (bf16 weights)
# ----------------------------------------------------------------------------
def init_params(key, *, in_ch, conv_feat, enc_out, proj_dim, hidden):
    ks = jax.random.split(key, 8)
    scale = 0.05

    def dense(k, fan_in, fan_out):
        return scale * jax.random.normal(k, (fan_in, fan_out), jnp.float32)

    return {
        # encoder conv: torch weight (F, C, 3, 3) -> matmul form (C*9, F)
        "conv_w": dense(ks[0], in_ch * 9, conv_feat),
        "conv_b": jnp.zeros((1, conv_feat), jnp.float32),
        "enc_fc_w": dense(ks[1], conv_feat, enc_out),
        "enc_fc_b": jnp.zeros((1, enc_out), jnp.float32),
        # projection head MLP(enc_out -> hidden -> proj_dim)
        "proj_w1": dense(ks[2], enc_out, hidden),
        "proj_b1": jnp.zeros((1, hidden), jnp.float32),
        "proj_g1": jnp.ones((1, hidden), jnp.float32),
        "proj_be1": jnp.zeros((1, hidden), jnp.float32),
        "proj_w2": dense(ks[3], hidden, proj_dim),
        "proj_b2": jnp.zeros((1, proj_dim), jnp.float32),
        # prediction head MLP(proj_dim -> hidden -> proj_dim)
        "pred_w1": dense(ks[4], proj_dim, hidden),
        "pred_b1": jnp.zeros((1, hidden), jnp.float32),
        "pred_g1": jnp.ones((1, hidden), jnp.float32),
        "pred_be1": jnp.zeros((1, hidden), jnp.float32),
        "pred_w2": dense(ks[5], hidden, proj_dim),
        "pred_b2": jnp.zeros((1, proj_dim), jnp.float32),
    }


def pad_params(p, *, in_ch, conv_feat, enc_out, proj_dim, hidden):
    K_pad = _round_up(in_ch * 9, 128)
    F_pad = _round_up(conv_feat, 128)
    E_pad = _round_up(enc_out, 128)
    H_pad = _round_up(hidden, 128)
    P_pad = _round_up(proj_dim, 128)

    def pad_w(w, r, c):   # weights -> bf16, zero-padded (pad rows/cols contribute 0)
        return jnp.pad(w, ((0, r - w.shape[0]), (0, c - w.shape[1]))).astype(jnp.bfloat16)

    def pad_v(v, c):      # bias / gamma / beta -> f32, zero-padded
        return jnp.pad(v, ((0, 0), (0, c - v.shape[1]))).astype(jnp.float32)

    return {
        "conv_w": pad_w(p["conv_w"], K_pad, F_pad),
        "conv_b": pad_v(p["conv_b"], F_pad),
        "enc_fc_w": pad_w(p["enc_fc_w"], F_pad, E_pad),
        "enc_fc_b": pad_v(p["enc_fc_b"], E_pad),
        "proj_w1": pad_w(p["proj_w1"], E_pad, H_pad),
        "proj_b1": pad_v(p["proj_b1"], H_pad),
        "proj_g1": pad_v(p["proj_g1"], H_pad),    # gamma pads are 0 -> pad cols stay 0
        "proj_be1": pad_v(p["proj_be1"], H_pad),
        "proj_w2": pad_w(p["proj_w2"], H_pad, P_pad),
        "proj_b2": pad_v(p["proj_b2"], P_pad),
        "pred_w1": pad_w(p["pred_w1"], P_pad, H_pad),
        "pred_b1": pad_v(p["pred_b1"], H_pad),
        "pred_g1": pad_v(p["pred_g1"], H_pad),
        "pred_be1": pad_v(p["pred_be1"], H_pad),
        "pred_w2": pad_w(p["pred_w2"], H_pad, P_pad),
        "pred_b2": pad_v(p["pred_b2"], P_pad),
    }


if __name__ == "__main__":
    key = jax.random.PRNGKey(0)
    k_x, k_p = jax.random.split(key)

    # Small shapes consistent with the module: NCHW images into the encoder,
    # encoder_out_features=32, projection_dim=16, MLP hidden=64.
    B, C, H, W = 2, 4, 16, 16
    CONV_F, ENC_OUT, PROJ_DIM, HIDDEN = 8, 32, 16, 64

    raw = init_params(k_p, in_ch=C, conv_feat=CONV_F, enc_out=ENC_OUT,
                      proj_dim=PROJ_DIM, hidden=HIDDEN)
    pp = pad_params(raw, in_ch=C, conv_feat=CONV_F, enc_out=ENC_OUT,
                    proj_dim=PROJ_DIM, hidden=HIDDEN)

    x = jax.random.normal(k_x, (B, C, H, W), dtype=jnp.float32)

    fwd = jax.jit(functools.partial(byol_online_forward, proj_dim=PROJ_DIM))
    out = jax.block_until_ready(fwd(pp, x))

    assert out.shape == (B, PROJ_DIM) and out.dtype == jnp.float32
    assert bool(jnp.all(jnp.isfinite(out)))
    print("KERNEL_OK")
</pallas_src>

<mosaic_0001>
module attributes {stable_mosaic.version = 11 : i64} {
  func.func @_byol_fused_kernel(%arg0: i32, %arg1: memref<1024x128xbf16, #tpu.memory_space<vmem>>, %arg2: memref<128x128xbf16, #tpu.memory_space<vmem>>, %arg3: memref<1x128xf32, #tpu.memory_space<vmem>>, %arg4: memref<128x128xbf16, #tpu.memory_space<vmem>>, %arg5: memref<1x128xf32, #tpu.memory_space<vmem>>, %arg6: memref<128x128xbf16, #tpu.memory_space<vmem>>, %arg7: memref<1x128xf32, #tpu.memory_space<vmem>>, %arg8: memref<1x128xf32, #tpu.memory_space<vmem>>, %arg9: memref<1x128xf32, #tpu.memory_space<vmem>>, %arg10: memref<128x128xbf16, #tpu.memory_space<vmem>>, %arg11: memref<1x128xf32, #tpu.memory_space<vmem>>, %arg12: memref<128x128xbf16, #tpu.memory_space<vmem>>, %arg13: memref<1x128xf32, #tpu.memory_space<vmem>>, %arg14: memref<1x128xf32, #tpu.memory_space<vmem>>, %arg15: memref<1x128xf32, #tpu.memory_space<vmem>>, %arg16: memref<128x128xbf16, #tpu.memory_space<vmem>>, %arg17: memref<1x128xf32, #tpu.memory_space<vmem>>, %arg18: memref<8x128xf32, #tpu.memory_space<vmem>>, %arg19: memref<2x4x128xf32, #tpu.memory_space<vmem>>) attributes {dimension_semantics = [#tpu.dimension_semantics<arbitrary>], iteration_bounds = array<i64: 2>, scalar_prefetch = 0 : i64, scratch_operands = 1 : i64, tpu.core_type = #tpu.core_type<tc>, window_params = [{transform_indices = @transform_0, window_bounds = array<i64: 1024, 128>}, {pipeline_mode = #tpu.pipeline_mode<synchronous>, transform_indices = @transform_1, window_bounds = array<i64: 128, 128>}, {pipeline_mode = #tpu.pipeline_mode<synchronous>, transform_indices = @transform_2, window_bounds = array<i64: 1, 128>}, {pipeline_mode = #tpu.pipeline_mode<synchronous>, transform_indices = @transform_3, window_bounds = array<i64: 128, 128>}, {pipeline_mode = #tpu.pipeline_mode<synchronous>, transform_indices = @transform_4, window_bounds = array<i64: 1, 128>}, {pipeline_mode = #tpu.pipeline_mode<synchronous>, transform_indices = @transform_5, window_bounds = array<i64: 128, 128>}, {pipeline_mode = #tpu.pipeline_mode<synchronous>, transform_indices = @transform_6, window_bounds = array<i64: 1, 128>}, {pipeline_mode = #tpu.pipeline_mode<synchronous>, transform_indices = @transform_7, window_bounds = array<i64: 1, 128>}, {pipeline_mode = #tpu.pipeline_mode<synchronous>, transform_indices = @transform_8, window_bounds = array<i64: 1, 128>}, {pipeline_mode = #tpu.pipeline_mode<synchronous>, transform_indices = @transform_9, window_bounds = array<i64: 128, 128>}, {pipeline_mode = #tpu.pipeline_mode<synchronous>, transform_indices = @transform_10, window_bounds = array<i64: 1, 128>}, {pipeline_mode = #tpu.pipeline_mode<synchronous>, transform_indices = @transform_11, window_bounds = array<i64: 128, 128>}, {pipeline_mode = #tpu.pipeline_mode<synchronous>, transform_indices = @transform_12, window_bounds = array<i64: 1, 128>}, {pipeline_mode = #tpu.pipeline_mode<synchronous>, transform_indices = @transform_13, window_bounds = array<i64: 1, 128>}, {pipeline_mode = #tpu.pipeline_mode<synchronous>, transform_indices = @transform_14, window_bounds = array<i64: 1, 128>}, {pipeline_mode = #tpu.pipeline_mode<synchronous>, transform_indices = @transform_15, window_bounds = array<i64: 128, 128>}, {pipeline_mode = #tpu.pipeline_mode<synchronous>, transform_indices = @transform_16, window_bounds = array<i64: 1, 128>}, {pipeline_mode = #tpu.pipeline_mode<synchronous>, transform_indices = @transform_17, window_bounds = array<i64: 8, 128>}]} {
    %c0 = arith.constant 0 : index
    %c0_0 = arith.constant 0 : index
    %0 = vector.load %arg2[%c0, %c0_0] : memref<128x128xbf16, #tpu.memory_space<vmem>>, vector<128x128xbf16>
    %c0_1 = arith.constant 0 : index
    %c0_2 = arith.constant 0 : index
    %1 = vector.load %arg3[%c0_1, %c0_2] : memref<1x128xf32, #tpu.memory_space<vmem>>, vector<1x128xf32>
    %c0_3 = arith.constant 0 : index
    %c0_4 = arith.constant 0 : index
    %2 = vector.load %arg1[%c0_3, %c0_4] : memref<1024x128xbf16, #tpu.memory_space<vmem>>, vector<256x128xbf16>
    %cst = arith.constant dense<0.000000e+00> : vector<256x128xf32>
    %3 = tpu.matmul %2, %0, %cst {dimension_numbers = #tpu.dot_dimension_numbers<[1], [0], [0], [1], [0, 0, 1, 1], [], []>} : vector<256x128xbf16>, vector<128x128xbf16>, vector<256x128xf32> -> vector<256x128xf32>
    %4 = vector.broadcast %1 : vector<1x128xf32> to vector<256x128xf32>
    %5 = arith.addf %3, %4 : vector<256x128xf32>
    %cst_5 = arith.constant 0.000000e+00 : f32
    %6 = vector.broadcast %cst_5 : f32 to vector<256x128xf32>
    %7 = arith.maximumf %5, %6 : vector<256x128xf32>
    %cst_6 = arith.constant dense<0.000000e+00> : vector<128xf32>
    %8 = vector.multi_reduction <add>, %7, %cst_6 [0] : vector<256x128xf32> to vector<128xf32>
    %9 = vector.shape_cast %8 : vector<128xf32> to vector<1x128xf32>
    %cst_7 = arith.constant 3.906250e-03 : f32
    %10 = vector.broadcast %cst_7 : f32 to vector<1x128xf32>
    %11 = arith.mulf %9, %10 : vector<1x128xf32>
    %c256 = arith.constant 256 : index
    %c0_8 = arith.constant 0 : index
    %12 = vector.load %arg1[%c256, %c0_8] : memref<1024x128xbf16, #tpu.memory_space<vmem>>, vector<256x128xbf16>
    %cst_9 = arith.constant dense<0.000000e+00> : vector<256x128xf32>
    %13 = tpu.matmul %12, %0, %cst_9 {dimension_numbers = #tpu.dot_dimension_numbers<[1], [0], [0], [1], [0, 0, 1, 1], [], []>} : vector<256x128xbf16>, vector<128x128xbf16>, vector<256x128xf32> -> vector<256x128xf32>
    %14 = vector.broadcast %1 : vector<1x128xf32> to vector<256x128xf32>
    %15 = arith.addf %13, %14 : vector<256x128xf32>
    %cst_10 = arith.constant 0.000000e+00 : f32
    %16 = vector.broadcast %cst_10 : f32 to vector<256x128xf32>
    %17 = arith.maximumf %15, %16 : vector<256x128xf32>
    %cst_11 = arith.constant dense<0.000000e+00> : vector<128xf32>
    %18 = vector.multi_reduction <add>, %17, %cst_11 [0] : vector<256x128xf32> to vector<128xf32>
    %19 = vector.shape_cast %18 : vector<128xf32> to vector<1x128xf32>
    %cst_12 = arith.constant 3.906250e-03 : f32
    %20 = vector.broadcast %cst_12 : f32 to vector<1x128xf32>
    %21 = arith.mulf %19, %20 : vector<1x128xf32>
    %c512 = arith.constant 512 : index
    %c0_13 = arith.constant 0 : index
    %22 = vector.load %arg1[%c512, %c0_13] : memref<1024x128xbf16, #tpu.memory_space<vmem>>, vector<256x128xbf16>
    %cst_14 = arith.constant dense<0.000000e+00> : vector<256x128xf32>
    %23 = tpu.matmul %22, %0, %cst_14 {dimension_numbers = #tpu.dot_dimension_numbers<[1], [0], [0], [1], [0, 0, 1, 1], [], []>} : vector<256x128xbf16>, vector<128x128xbf16>, vector<256x128xf32> -> vector<256x128xf32>
    %24 = vector.broadcast %1 : vector<1x128xf32> to vector<256x128xf32>
    %25 = arith.addf %23, %24 : vector<256x128xf32>
    %cst_15 = arith.constant 0.000000e+00 : f32
    %26 = vector.broadcast %cst_15 : f32 to vector<256x128xf32>
    %27 = arith.maximumf %25, %26 : vector<256x128xf32>
    %cst_16 = arith.constant dense<0.000000e+00> : vector<128xf32>
    %28 = vector.multi_reduction <add>, %27, %cst_16 [0] : vector<256x128xf32> to vector<128xf32>
    %29 = vector.shape_cast %28 : vector<128xf32> to vector<1x128xf32>
    %cst_17 = arith.constant 3.906250e-03 : f32
    %30 = vector.broadcast %cst_17 : f32 to vector<1x128xf32>
    %31 = arith.mulf %29, %30 : vector<1x128xf32>
    %c768 = arith.constant 768 : index
    %c0_18 = arith.constant 0 : index
    %32 = vector.load %arg1[%c768, %c0_18] : memref<1024x128xbf16, #tpu.memory_space<vmem>>, vector<256x128xbf16>
    %cst_19 = arith.constant dense<0.000000e+00> : vector<256x128xf32>
    %33 = tpu.matmul %32, %0, %cst_19 {dimension_numbers = #tpu.dot_dimension_numbers<[1], [0], [0], [1], [0, 0, 1, 1], [], []>} : vector<256x128xbf16>, vector<128x128xbf16>, vector<256x128xf32> -> vector<256x128xf32>
    %34 = vector.broadcast %1 : vector<1x128xf32> to vector<256x128xf32>
    %35 = arith.addf %33, %34 : vector<256x128xf32>
    %cst_20 = arith.constant 0.000000e+00 : f32
    %36 = vector.broadcast %cst_20 : f32 to vector<256x128xf32>
    %37 = arith.maximumf %35, %36 : vector<256x128xf32>
    %cst_21 = arith.constant dense<0.000000e+00> : vector<128xf32>
    %38 = vector.multi_reduction <add>, %37, %cst_21 [0] : vector<256x128xf32> to vector<128xf32>
    %39 = vector.shape_cast %38 : vector<128xf32> to vector<1x128xf32>
    %cst_22 = arith.constant 3.906250e-03 : f32
    %40 = vector.broadcast %cst_22 : f32 to vector<1x128xf32>
    %41 = arith.mulf %39, %40 : vector<1x128xf32>
    %42 = tpu.concatenate %11, %21, %31, %41 in 0 : vector<1x128xf32>, vector<1x128xf32>, vector<1x128xf32>, vector<1x128xf32> -> vector<4x128xf32>
    %43 = arith.index_cast %arg0 : i32 to index
    %c0_23 = arith.constant 0 : index
    %c0_24 = arith.constant 0 : index
    %44 = vector.load %arg19[%43, %c0_23, %c0_24] : memref<2x4x128xf32, #tpu.memory_space<vmem>>, vector<1x4x128xf32>
    %45 = vector.shape_cast %44 : vector<1x4x128xf32> to vector<4x128xf32>
    %46 = vector.shape_cast %42 : vector<4x128xf32> to vector<1x4x128xf32>
    tpu.vector_store %arg19[%43, %c0_23, %c0_24], %46 {strides = array<i32>} : memref<2x4x128xf32, #tpu.memory_space<vmem>>, vector<1x4x128xf32>,
    %c1_i32 = arith.constant 1 : i32
    %47 = arith.cmpi eq, %arg0, %c1_i32 : i32
    %48 = arith.extui %47 : i1 to i32
    %c0_i32 = arith.constant 0 : i32
    %49 = arith.cmpi ne, %48, %c0_i32 : i32
    scf.if %49 {
      %c0_25 = arith.constant 0 : index
      %c0_26 = arith.constant 0 : index
      %c0_27 = arith.constant 0 : index
      %50 = vector.load %arg19[%c0_25, %c0_26, %c0_27] : memref<2x4x128xf32, #tpu.memory_space<vmem>>, vector<1x4x128xf32>
      %51 = vector.shape_cast %50 : vector<1x4x128xf32> to vector<4x128xf32>
      %c1 = arith.constant 1 : index
      %c0_28 = arith.constant 0 : index
      %c0_29 = arith.constant 0 : index
      %52 = vector.load %arg19[%c1, %c0_28, %c0_29] : memref<2x4x128xf32, #tpu.memory_space<vmem>>, vector<1x4x128xf32>
      %53 = vector.shape_cast %52 : vector<1x4x128xf32> to vector<4x128xf32>
      %54 = tpu.concatenate %51, %53 in 0 : vector<4x128xf32>, vector<4x128xf32> -> vector<8x128xf32>
      %55 = tpu.iota {dimensions = array<i32: 0>} : vector<8x1xi32>
      %c2_i32 = arith.constant 2 : i32
      %56 = vector.broadcast %c2_i32 : i32 to vector<8x1xi32>
      %57 = arith.cmpi slt, %55, %56 : vector<8x1xi32>
      %58 = arith.extui %57 : vector<8x1xi1> to vector<8x1xi32>
      %59 = arith.sitofp %58 : vector<8x1xi32> to vector<8x1xf32>
      %60 = arith.truncf %54 : vector<8x128xf32> to vector<8x128xbf16>
      %c0_30 = arith.constant 0 : index
      %c0_31 = arith.constant 0 : index
      %61 = vector.load %arg4[%c0_30, %c0_31] : memref<128x128xbf16, #tpu.memory_space<vmem>>, vector<128x128xbf16>
      %cst_32 = arith.constant dense<0.000000e+00> : vector<8x128xf32>
      %62 = tpu.matmul %60, %61, %cst_32 {dimension_numbers = #tpu.dot_dimension_numbers<[1], [0], [0], [1], [0, 0, 1, 1], [], []>} : vector<8x128xbf16>, vector<128x128xbf16>, vector<8x128xf32> -> vector<8x128xf32>
      %c0_33 = arith.constant 0 : index
      %c0_34 = arith.constant 0 : index
      %63 = vector.load %arg5[%c0_33, %c0_34] : memref<1x128xf32, #tpu.memory_space<vmem>>, vector<1x128xf32>
      %64 = vector.broadcast %63 : vector<1x128xf32> to vector<8x128xf32>
      %65 = arith.addf %62, %64 : vector<8x128xf32>
      %66 = arith.truncf %65 : vector<8x128xf32> to vector<8x128xbf16>
      %c0_35 = arith.constant 0 : index
      %c0_36 = arith.constant 0 : index
      %67 = vector.load %arg6[%c0_35, %c0_36] : memref<128x128xbf16, #tpu.memory_space<vmem>>, vector<128x128xbf16>
      %cst_37 = arith.constant dense<0.000000e+00> : vector<8x128xf32>
      %68 = tpu.matmul %66, %67, %cst_37 {dimension_numbers = #tpu.dot_dimension_numbers<[1], [0], [0], [1], [0, 0, 1, 1], [], []>} : vector<8x128xbf16>, vector<128x128xbf16>, vector<8x128xf32> -> vector<8x128xf32>
      %c0_38 = arith.constant 0 : index
      %c0_39 = arith.constant 0 : index
      %69 = vector.load %arg7[%c0_38, %c0_39] : memref<1x128xf32, #tpu.memory_space<vmem>>, vector<1x128xf32>
      %70 = vector.broadcast %69 : vector<1x128xf32> to vector<8x128xf32>
      %71 = arith.addf %68, %70 : vector<8x128xf32>
      %72 = vector.broadcast %59 : vector<8x1xf32> to vector<8x128xf32>
      %73 = arith.mulf %71, %72 : vector<8x128xf32>
      %cst_40 = arith.constant dense<0.000000e+00> : vector<128xf32>
      %74 = vector.multi_reduction <add>, %73, %cst_40 [0] : vector<8x128xf32> to vector<128xf32>
      %75 = vector.shape_cast %74 : vector<128xf32> to vector<1x128xf32>
      %cst_41 = arith.constant 5.000000e-01 : f32
      %76 = vector.broadcast %cst_41 : f32 to vector<1x128xf32>
      %77 = arith.mulf %75, %76 : vector<1x128xf32>
      %78 = vector.broadcast %77 : vector<1x128xf32> to vector<8x128xf32>
      %79 = arith.subf %71, %78 : vector<8x128xf32>
      %80 = arith.mulf %79, %79 : vector<8x128xf32>
      %81 = vector.broadcast %59 : vector<8x1xf32> to vector<8x128xf32>
      %82 = arith.mulf %80, %81 : vector<8x128xf32>
      %cst_42 = arith.constant dense<0.000000e+00> : vector<128xf32>
      %83 = vector.multi_reduction <add>, %82, %cst_42 [0] : vector<8x128xf32> to vector<128xf32>
      %84 = vector.shape_cast %83 : vector<128xf32> to vector<1x128xf32>
      %cst_43 = arith.constant 5.000000e-01 : f32
      %85 = vector.broadcast %cst_43 : f32 to vector<1x128xf32>
      %86 = arith.mulf %84, %85 : vector<1x128xf32>
      %cst_44 = arith.constant 9.99999974E-6 : f32
      %87 = vector.broadcast %cst_44 : f32 to vector<1x128xf32>
      %88 = arith.addf %86, %87 : vector<1x128xf32>
      %89 = math.rsqrt %88 : vector<1x128xf32>
      %90 = vector.broadcast %89 : vector<1x128xf32> to vector<8x128xf32>
      %91 = arith.mulf %79, %90 : vector<8x128xf32>
      %c0_45 = arith.constant 0 : index
      %c0_46 = arith.constant 0 : index
      %92 = vector.load %arg8[%c0_45, %c0_46] : memref<1x128xf32, #tpu.memory_space<vmem>>, vector<1x128xf32>
      %93 = vector.broadcast %92 : vector<1x128xf32> to vector<8x128xf32>
      %94 = arith.mulf %91, %93 : vector<8x128xf32>
      %c0_47 = arith.constant 0 : index
      %c0_48 = arith.constant 0 : index
      %95 = vector.load %arg9[%c0_47, %c0_48] : memref<1x128xf32, #tpu.memory_space<vmem>>, vector<1x128xf32>
      %96 = vector.broadcast %95 : vector<1x128xf32> to vector<8x128xf32>
      %97 = arith.addf %94, %96 : vector<8x128xf32>
      %cst_49 = arith.constant 0.000000e+00 : f32
      %98 = vector.broadcast %cst_49 : f32 to vector<8x128xf32>
      %99 = arith.maximumf %97, %98 : vector<8x128xf32>
      %100 = arith.truncf %99 : vector<8x128xf32> to vector<8x128xbf16>
      %c0_50 = arith.constant 0 : index
      %c0_51 = arith.constant 0 : index
      %101 = vector.load %arg10[%c0_50, %c0_51] : memref<128x128xbf16, #tpu.memory_space<vmem>>, vector<128x128xbf16>
      %cst_52 = arith.constant dense<0.000000e+00> : vector<8x128xf32>
      %102 = tpu.matmul %100, %101, %cst_52 {dimension_numbers = #tpu.dot_dimension_numbers<[1], [0], [0], [1], [0, 0, 1, 1], [], []>} : vector<8x128xbf16>, vector<128x128xbf16>, vector<8x128xf32> -> vector<8x128xf32>
      %c0_53 = arith.constant 0 : index
      %c0_54 = arith.constant 0 : index
      %103 = vector.load %arg11[%c0_53, %c0_54] : memref<1x128xf32, #tpu.memory_space<vmem>>, vector<1x128xf32>
      %104 = vector.broadcast %103 : vector<1x128xf32> to vector<8x128xf32>
      %105 = arith.addf %102, %104 : vector<8x128xf32>
      %106 = arith.truncf %105 : vector<8x128xf32> to vector<8x128xbf16>
      %c0_55 = arith.constant 0 : index
      %c0_56 = arith.constant 0 : index
      %107 = vector.load %arg12[%c0_55, %c0_56] : memref<128x128xbf16, #tpu.memory_space<vmem>>, vector<128x128xbf16>
      %cst_57 = arith.constant dense<0.000000e+00> : vector<8x128xf32>
      %108 = tpu.matmul %106, %107, %cst_57 {dimension_numbers = #tpu.dot_dimension_numbers<[1], [0], [0], [1], [0, 0, 1, 1], [], []>} : vector<8x128xbf16>, vector<128x128xbf16>, vector<8x128xf32> -> vector<8x128xf32>
      %c0_58 = arith.constant 0 : index
      %c0_59 = arith.constant 0 : index
      %109 = vector.load %arg13[%c0_58, %c0_59] : memref<1x128xf32, #tpu.memory_space<vmem>>, vector<1x128xf32>
      %110 = vector.broadcast %109 : vector<1x128xf32> to vector<8x128xf32>
      %111 = arith.addf %108, %110 : vector<8x128xf32>
      %112 = vector.broadcast %59 : vector<8x1xf32> to vector<8x128xf32>
      %113 = arith.mulf %111, %112 : vector<8x128xf32>
      %cst_60 = arith.constant dense<0.000000e+00> : vector<128xf32>
      %114 = vector.multi_reduction <add>, %113, %cst_60 [0] : vector<8x128xf32> to vector<128xf32>
      %115 = vector.shape_cast %114 : vector<128xf32> to vector<1x128xf32>
      %cst_61 = arith.constant 5.000000e-01 : f32
      %116 = vector.broadcast %cst_61 : f32 to vector<1x128xf32>
      %117 = arith.mulf %115, %116 : vector<1x128xf32>
      %118 = vector.broadcast %117 : vector<1x128xf32> to vector<8x128xf32>
      %119 = arith.subf %111, %118 : vector<8x128xf32>
      %120 = arith.mulf %119, %119 : vector<8x128xf32>
      %121 = vector.broadcast %59 : vector<8x1xf32> to vector<8x128xf32>
      %122 = arith.mulf %120, %121 : vector<8x128xf32>
      %cst_62 = arith.constant dense<0.000000e+00> : vector<128xf32>
      %123 = vector.multi_reduction <add>, %122, %cst_62 [0] : vector<8x128xf32> to vector<128xf32>
      %124 = vector.shape_cast %123 : vector<128xf32> to vector<1x128xf32>
      %cst_63 = arith.constant 5.000000e-01 : f32
      %125 = vector.broadcast %cst_63 : f32 to vector<1x128xf32>
      %126 = arith.mulf %124, %125 : vector<1x128xf32>
      %cst_64 = arith.constant 9.99999974E-6 : f32
      %127 = vector.broadcast %cst_64 : f32 to vector<1x128xf32>
      %128 = arith.addf %126, %127 : vector<1x128xf32>
      %129 = math.rsqrt %128 : vector<1x128xf32>
      %130 = vector.broadcast %129 : vector<1x128xf32> to vector<8x128xf32>
      %131 = arith.mulf %119, %130 : vector<8x128xf32>
      %c0_65 = arith.constant 0 : index
      %c0_66 = arith.constant 0 : index
      %132 = vector.load %arg14[%c0_65, %c0_66] : memref<1x128xf32, #tpu.memory_space<vmem>>, vector<1x128xf32>
      %133 = vector.broadcast %132 : vector<1x128xf32> to vector<8x128xf32>
      %134 = arith.mulf %131, %133 : vector<8x128xf32>
      %c0_67 = arith.constant 0 : index
      %c0_68 = arith.constant 0 : index
      %135 = vector.load %arg15[%c0_67, %c0_68] : memref<1x128xf32, #tpu.memory_space<vmem>>, vector<1x128xf32>
      %136 = vector.broadcast %135 : vector<1x128xf32> to vector<8x128xf32>
      %137 = arith.addf %134, %136 : vector<8x128xf32>
      %cst_69 = arith.constant 0.000000e+00 : f32
      %138 = vector.broadcast %cst_69 : f32 to vector<8x128xf32>
      %139 = arith.maximumf %137, %138 : vector<8x128xf32>
      %140 = arith.truncf %139 : vector<8x128xf32> to vector<8x128xbf16>
      %c0_70 = arith.constant 0 : index
      %c0_71 = arith.constant 0 : index
      %141 = vector.load %arg16[%c0_70, %c0_71] : memref<128x128xbf16, #tpu.memory_space<vmem>>, vector<128x128xbf16>
      %cst_72 = arith.constant dense<0.000000e+00> : vector<8x128xf32>
      %142 = tpu.matmul %140, %141, %cst_72 {dimension_numbers = #tpu.dot_dimension_numbers<[1], [0], [0], [1], [0, 0, 1, 1], [], []>} : vector<8x128xbf16>, vector<128x128xbf16>, vector<8x128xf32> -> vector<8x128xf32>
      %c0_73 = arith.constant 0 : index
      %c0_74 = arith.constant 0 : index
      %143 = vector.load %arg17[%c0_73, %c0_74] : memref<1x128xf32, #tpu.memory_space<vmem>>, vector<1x128xf32>
      %144 = vector.broadcast %143 : vector<1x128xf32> to vector<8x128xf32>
      %145 = arith.addf %142, %144 : vector<8x128xf32>
      %c0_75 = arith.constant 0 : index
      %c0_76 = arith.constant 0 : index
      %146 = vector.load %arg18[%c0_75, %c0_76] : memref<8x128xf32, #tpu.memory_space<vmem>>, vector<8x128xf32>
      tpu.vector_store %arg18[%c0_75, %c0_76], %145 {strides = array<i32>} : memref<8x128xf32, #tpu.memory_space<vmem>>, vector<8x128xf32>,
    } else {
    }
    return
  }
  func.func @transform_0(%arg0: i32) -> (i32, i32) {
    %c0_i32 = arith.constant 0 : i32
    %c0_i32_0 = arith.constant 0 : i32
    return %arg0, %c0_i32 : i32, i32
  }
  func.func @transform_1(%arg0: i32) -> (i32, i32) {
    %c0_i32 = arith.constant 0 : i32
    %c0_i32_0 = arith.constant 0 : i32
    %c0_i32_1 = arith.constant 0 : i32
    return %c0_i32, %c0_i32_0 : i32, i32
  }
  func.func @transform_2(%arg0: i32) -> (i32, i32) {
    %c0_i32 = arith.constant 0 : i32
    %c0_i32_0 = arith.constant 0 : i32
    %c0_i32_1 = arith.constant 0 : i32
    return %c0_i32, %c0_i32_0 : i32, i32
  }
  func.func @transform_3(%arg0: i32) -> (i32, i32) {
    %c0_i32 = arith.constant 0 : i32
    %c0_i32_0 = arith.constant 0 : i32
    %c0_i32_1 = arith.constant 0 : i32
    return %c0_i32, %c0_i32_0 : i32, i32
  }
  func.func @transform_4(%arg0: i32) -> (i32, i32) {
    %c0_i32 = arith.constant 0 : i32
    %c0_i32_0 = arith.constant 0 : i32
    %c0_i32_1 = arith.constant 0 : i32
    return %c0_i32, %c0_i32_0 : i32, i32
  }
  func.func @transform_5(%arg0: i32) -> (i32, i32) {
    %c0_i32 = arith.constant 0 : i32
    %c0_i32_0 = arith.constant 0 : i32
    %c0_i32_1 = arith.constant 0 : i32
    return %c0_i32, %c0_i32_0 : i32, i32
  }
  func.func @transform_6(%arg0: i32) -> (i32, i32) {
    %c0_i32 = arith.constant 0 : i32
    %c0_i32_0 = arith.constant 0 : i32
    %c0_i32_1 = arith.constant 0 : i32
    return %c0_i32, %c0_i32_0 : i32, i32
  }
  func.func @transform_7(%arg0: i32) -> (i32, i32) {
    %c0_i32 = arith.constant 0 : i32
    %c0_i32_0 = arith.constant 0 : i32
    %c0_i32_1 = arith.constant 0 : i32
    return %c0_i32, %c0_i32_0 : i32, i32
  }
  func.func @transform_8(%arg0: i32) -> (i32, i32) {
    %c0_i32 = arith.constant 0 : i32
    %c0_i32_0 = arith.constant 0 : i32
    %c0_i32_1 = arith.constant 0 : i32
    return %c0_i32, %c0_i32_0 : i32, i32
  }
  func.func @transform_9(%arg0: i32) -> (i32, i32) {
    %c0_i32 = arith.constant 0 : i32
    %c0_i32_0 = arith.constant 0 : i32
    %c0_i32_1 = arith.constant 0 : i32
    return %c0_i32, %c0_i32_0 : i32, i32
  }
  func.func @transform_10(%arg0: i32) -> (i32, i32) {
    %c0_i32 = arith.constant 0 : i32
    %c0_i32_0 = arith.constant 0 : i32
    %c0_i32_1 = arith.constant 0 : i32
    return %c0_i32, %c0_i32_0 : i32, i32
  }
  func.func @transform_11(%arg0: i32) -> (i32, i32) {
    %c0_i32 = arith.constant 0 : i32
    %c0_i32_0 = arith.constant 0 : i32
    %c0_i32_1 = arith.constant 0 : i32
    return %c0_i32, %c0_i32_0 : i32, i32
  }
  func.func @transform_12(%arg0: i32) -> (i32, i32) {
    %c0_i32 = arith.constant 0 : i32
    %c0_i32_0 = arith.constant 0 : i32
    %c0_i32_1 = arith.constant 0 : i32
    return %c0_i32, %c0_i32_0 : i32, i32
  }
  func.func @transform_13(%arg0: i32) -> (i32, i32) {
    %c0_i32 = arith.constant 0 : i32
    %c0_i32_0 = arith.constant 0 : i32
    %c0_i32_1 = arith.constant 0 : i32
    return %c0_i32, %c0_i32_0 : i32, i32
  }
  func.func @transform_14(%arg0: i32) -> (i32, i32) {
    %c0_i32 = arith.constant 0 : i32
    %c0_i32_0 = arith.constant 0 : i32
    %c0_i32_1 = arith.constant 0 : i32
    return %c0_i32, %c0_i32_0 : i32, i32
  }
  func.func @transform_15(%arg0: i32) -> (i32, i32) {
    %c0_i32 = arith.constant 0 : i32
    %c0_i32_0 = arith.constant 0 : i32
    %c0_i32_1 = arith.constant 0 : i32
    return %c0_i32, %c0_i32_0 : i32, i32
  }
  func.func @transform_16(%arg0: i32) -> (i32, i32) {
    %c0_i32 = arith.constant 0 : i32
    %c0_i32_0 = arith.constant 0 : i32
    %c0_i32_1 = arith.constant 0 : i32
    return %c0_i32, %c0_i32_0 : i32, i32
  }
  func.func @transform_17(%arg0: i32) -> (i32, i32) {
    %c0_i32 = arith.constant 0 : i32
    %c0_i32_0 = arith.constant 0 : i32
    %c0_i32_1 = arith.constant 0 : i32
    return %c0_i32, %c0_i32_0 : i32, i32
  }
}

</mosaic_0001>

<bundles_post_ra>
// kernel: byol_online_forward.1
= control target key start
LH: loop header
LB: loop body
LE: loop exit
PB: predicated region body
PF: predicated region fallthrough
CT: control target
= control target key end

     0   :  { %s3530_s24 = smov 0   ;;  %s4055_s0 = inlined_call_operand.vmem [shape: bf16[2048,128], index: 0, kind: input, shape index: {}]   ;;  %s4056_s1 = inlined_call_operand.vmem [shape: bf16[128,128], index: 1, kind: input, shape index: {}]   ;;  %s4057_s2 = inlined_call_operand.vmem [shape: f32[1,128], index: 2, kind: input, shape index: {}]   ;;  %s4058_s3 = inlined_call_operand.vmem [shape: bf16[128,128], index: 3, kind: input, shape index: {}]   ;;  %s4059_s4 = inlined_call_operand.vmem [shape: f32[1,128], index: 4, kind: input, shape index: {}]   ;;  %s4060_s5 = inlined_call_operand.vmem [shape: bf16[128,128], index: 5, kind: input, shape index: {}]   ;;  %s4061_s6 = inlined_call_operand.vmem [shape: f32[1,128], index: 6, kind: input, shape index: {}]   ;;  %s4062_s7 = inlined_call_operand.vmem [shape: f32[1,128], index: 7, kind: input, shape index: {}]   ;;  %s4063_s8 = inlined_call_operand.vmem [shape: f32[1,128], index: 8, kind: input, shape index: {}]   ;;  %s4064_s9 = inlined_call_operand.vmem [shape: bf16[128,128], index: 9, kind: input, shape index: {}]   ;;  %s4065_s10 = inlined_call_operand.vmem [shape: f32[1,128], index: 10, kind: input, shape index: {}]   ;;  %s4066_s11 = inlined_call_operand.vmem [shape: bf16[128,128], index: 11, kind: input, shape index: {}]   ;;  %s4067_s12 = inlined_call_operand.vmem [shape: f32[1,128], index: 12, kind: input, shape index: {}]   ;;  %s4068_s13 = inlined_call_operand.vmem [shape: f32[1,128], index: 13, kind: input, shape index: {}]   ;;  %s4069_s14 = inlined_call_operand.vmem [shape: f32[1,128], index: 14, kind: input, shape index: {}]   ;;  %s4070_s15 = inlined_call_operand.vmem [shape: bf16[128,128], index: 15, kind: input, shape index: {}]   ;;  %s4071_s16 = inlined_call_operand.vmem [shape: f32[1,128], index: 16, kind: input, shape index: {}]   ;;  %s4072_s17 = inlined_call_operand.vmem [shape: f32[8,128], index: 17, kind: output, shape index: {}]  }
   0x1   :  { %4074 = sst [smem:[#allocation3_spill]] %s4055_s0 }
   0x2   :  { %4075 = sst [smem:[#allocation4_spill]] %s4056_s1 }
   0x3 LB: > { %s3536_s25 = sadd.s32 4294967295, %s3436_s24   ;;  %p2740_p0 = scmp.ge.s32.totalorder %s3436_s24, 1  ;;  %s3436_s24 = sphi %s3530_s24, %s27_s24  }
   0x4   : > { %p483_p1 = scmp.lt.s32.totalorder %s3436_s24, 3 }
   0x6   : > { %p484_p2 = pnand %p2740_p0, %p483_p1 }
   0x7   : > { %s4076_s28 = sld [smem:[#allocation4_spill]] (!%p484_p2)  ;;  %s2741_s29 = sshll.u32 (!%p484_p2), %s3536_s25, 7  ;;  %vm2044_vm0 = vcmask (!%p484_p2), 1040384   ;;  %vm2046_vm1 = vcmask (!%p484_p2), 1041408   ;;  %vm2048_vm2 = vcmask (!%p484_p2), 1042432  }
   0x8   : > { %487 = sbr.rel (%p484_p2) target bundleno = 1627 (0x65b), region = 88  ;;  %p531_p3 = scmp.lt.s32.totalorder (!%p484_p2), %s2741_s29, 255 }
   0x9   : > { %s4077_s22 = sld [smem:[#allocation3_spill]] (!%p484_p2)  ;;  %p2817_p4 = scmp.ne.s32.totalorder (!%p484_p2), %s3536_s25, 1 }
   0xd   : > { %v3313_v0 = vld [vmem:[%s4076_s28] sm:$0xff] (!%p484_p2)   ;;  %v3547_v1 = vld [vmem:[%s4076_s28 + $0x8] sm:$0xff] (!%p484_p2)   ;;  %v3554_v2 = vld [vmem:[%s4076_s28 + $0x10] sm:$0xff] (!%p484_p2)  }
   0xe   : > { %3011 = vmatprep.subr.bf16.mxu0 (!%p484_p2), %v3313_v0  ;;  %3059 = vmatprep.subr.bf16.mxu1 (!%p484_p2), %v3313_v0  ;;  %v3566_v3 = vld [vmem:[%s4076_s28 + $0x18] sm:$0xff] (!%p484_p2)   ;;  %v3579_v6 = vld [vmem:[%s4076_s28 + $0x20] sm:$0xff] (!%p484_p2)   ;;  %v3588_v7 = vld [vmem:[%s4076_s28 + $0x28] sm:$0xff] (!%p484_p2)  }
   0xf   : > { %3012 = vmatpush3.bf16.msra.mxu0 %v3313_v0  ;;  %3060 = vmatpush3.bf16.msra.mxu1 %v3313_v0  ;;  %s4079_s29 = smov (!%p531_p3, %s2741_s29), 255  ;;  %v3597_v8 = vld [vmem:[%s4076_s28 + $0x30] sm:$0xff]   ;;  %v3606_v9 = vld [vmem:[%s4076_s28 + $0x38] sm:$0xff]   ;;  %vm3439_vm3 = vmmov (!%p2817_p4), 0   ;;  %vm2063_vm4 = vcmask (!%p2817_p4), 1043456  }
  0x10   : > { %3013 = vmatprep.subr.bf16.mxu0 %v3547_v1  ;;  %3061 = vmatprep.subr.bf16.mxu1 %v3547_v1  ;;  %s2742_s1 = sshll.u32 %s4079_s29, 2  ;;  %s2816_s29 = sshll.u32 %s3536_s25, 2 }
  0x11   : > { %s3559_s23 = scalar_lea.vmem %s4077_s22, %s2742_s1  ;;  %s2051_s0 = scalar_lea.vmem [#allocation2], %s2816_s29 }
  0x12   : > { %v3321_v4 = vld [vmem:[%s3559_s23] sm:$0xff]   ;;  %v3323_v10 = vld [vmem:[%s3559_s23 + $0x8] sm:$0xff]   ;;  %v3325_v12 = vld [vmem:[%s3559_s23 + $0x10] sm:$0xff]  }
  0x13   : > { %3014 = vmatpush3.bf16.msra.mxu0 %v3547_v1  ;;  %3062 = vmatpush3.bf16.msra.mxu1 %v3547_v1  ;;  %v3322_v5 = vld [vmem:[%s3559_s23 + $0x80] sm:$0xff]   ;;  %v3324_v11 = vld [vmem:[%s3559_s23 + $0x88] sm:$0xff]   ;;  %v3326_v13 = vld [vmem:[%s3559_s23 + $0x90] sm:$0xff]  }
  0x14   : > { %3015 = vmatprep.subr.bf16.mxu0 %v3554_v2  ;;  %3063 = vmatprep.subr.bf16.mxu1 %v3554_v2  ;;  %v3327_v14 = vld [vmem:[%s3559_s23 + $0x18] sm:$0xff]   ;;  %v3329_v16 = vld [vmem:[%s3559_s23 + $0x20] sm:$0xff]   ;;  %v3331_v18 = vld [vmem:[%s3559_s23 + $0x28] sm:$0xff]  }
  0x15   : > { %3027 = vmatprep.mubr.bf16.mxu0 %v3321_v4  ;;  %3075 = vmatprep.mubr.bf16.mxu1 %v3322_v5  ;;  %v3328_v15 = vld [vmem:[%s3559_s23 + $0x98] sm:$0xff]   ;;  %v3330_v17 = vld [vmem:[%s3559_s23 + $0xa0] sm:$0xff]   ;;  %v3332_v19 = vld [vmem:[%s3559_s23 + $0xa8] sm:$0xff]  }
  0x16   : > { %v3333_v20 = vld [vmem:[%s3559_s23 + $0x30] sm:$0xff]   ;;  %v3335_v22 = vld [vmem:[%s3559_s23 + $0x38] sm:$0xff]   ;;  %v3337_v24 = vld [vmem:[%s3559_s23 + $0x40] sm:$0xff]  }
  0x17   : > { %3016 = vmatpush3.bf16.msra.mxu0 %v3554_v2  ;;  %3064 = vmatpush3.bf16.msra.mxu1 %v3554_v2  ;;  %v3334_v21 = vld [vmem:[%s3559_s23 + $0xb0] sm:$0xff]   ;;  %v3336_v23 = vld [vmem:[%s3559_s23 + $0xb8] sm:$0xff]   ;;  %v3338_v25 = vld [vmem:[%s3559_s23 + $0xc0] sm:$0xff]  }
  0x18   : > { %3017 = vmatprep.subr.bf16.mxu0 %v3566_v3  ;;  %3065 = vmatprep.subr.bf16.mxu1 %v3566_v3  ;;  %v3339_v26 = vld [vmem:[%s3559_s23 + $0x48] sm:$0xff]   ;;  %v3341_v28 = vld [vmem:[%s3559_s23 + $0x50] sm:$0xff]   ;;  %v3343_v30 = vld [vmem:[%s3559_s23 + $0x58] sm:$0xff]  }
  0x19   : > { %v3340_v27 = vld [vmem:[%s3559_s23 + $0xc8] sm:$0xff]   ;;  %v3342_v29 = vld [vmem:[%s3559_s23 + $0xd0] sm:$0xff]   ;;  %v3344_v31 = vld [vmem:[%s3559_s23 + $0xd8] sm:$0xff]  }
  0x1a   : > { %v3345_v32 = vld [vmem:[%s3559_s23 + $0x60] sm:$0xff]   ;;  %v3347_v34 = vld [vmem:[%s3559_s23 + $0x68] sm:$0xff]   ;;  %v3349_v36 = vld [vmem:[%s3559_s23 + $0x70] sm:$0xff]  }
  0x1b   : > { %3018 = vmatpush3.bf16.msra.mxu0 %v3566_v3  ;;  %3066 = vmatpush3.bf16.msra.mxu1 %v3566_v3  ;;  %v3346_v33 = vld [vmem:[%s3559_s23 + $0xe0] sm:$0xff]   ;;  %v3348_v35 = vld [vmem:[%s3559_s23 + $0xe8] sm:$0xff]   ;;  %v3350_v37 = vld [vmem:[%s3559_s23 + $0xf0] sm:$0xff]  }
  0x1c   : > { %3019 = vmatprep.subr.bf16.mxu0 %v3579_v6  ;;  %3067 = vmatprep.subr.bf16.mxu1 %v3579_v6  ;;  %v3351_v38 = vld [vmem:[%s3559_s23 + $0x78] sm:$0xff]   ;;  %v3353_v40 = vld [vmem:[%s3559_s23 + $0x100] sm:$0xff]   ;;  %v3355_v42 = vld [vmem:[%s3559_s23 + $0x108] sm:$0xff]  }
  0x1d   : > { %v3352_v39 = vld [vmem:[%s3559_s23 + $0xf8] sm:$0xff]   ;;  %v3354_v41 = vld [vmem:[%s3559_s23 + $0x180] sm:$0xff]   ;;  %v3356_v43 = vld [vmem:[%s3559_s23 + $0x188] sm:$0xff]  }
  0x1e   : > { %v3357_v44 = vld [vmem:[%s3559_s23 + $0x110] sm:$0xff]   ;;  %v3359_v46 = vld [vmem:[%s3559_s23 + $0x118] sm:$0xff]   ;;  %v3361_v48 = vld [vmem:[%s3559_s23 + $0x120] sm:$0xff]  }
  0x1f   : > { %3020 = vmatpush3.bf16.msra.mxu0 %v3579_v6  ;;  %3068 = vmatpush3.bf16.msra.mxu1 %v3579_v6  ;;  %v3358_v45 = vld [vmem:[%s3559_s23 + $0x190] sm:$0xff]   ;;  %v3360_v47 = vld [vmem:[%s3559_s23 + $0x198] sm:$0xff]   ;;  %v3362_v49 = vld [vmem:[%s3559_s23 + $0x1a0] sm:$0xff]  }
  0x20   : > { %3021 = vmatprep.subr.bf16.mxu0 %v3588_v7  ;;  %3069 = vmatprep.subr.bf16.mxu1 %v3588_v7  ;;  %v3363_v50 = vld [vmem:[%s3559_s23 + $0x128] sm:$0xff]   ;;  %v3365_v52 = vld [vmem:[%s3559_s23 + $0x130] sm:$0xff]   ;;  %v3367_v54 = vld [vmem:[%s3559_s23 + $0x138] sm:$0xff]  }
  0x21   : > { %v3364_v51 = vld [vmem:[%s3559_s23 + $0x1a8] sm:$0xff]   ;;  %v3366_v53 = vld [vmem:[%s3559_s23 + $0x1b0] sm:$0xff]   ;;  %v3368_v55 = vld [vmem:[%s3559_s23 + $0x1b8] sm:$0xff]  }
  0x22   : > { %v3369_v56 = vld [vmem:[%s3559_s23 + $0x140] sm:$0xff]   ;;  %v3371_v58 = vld [vmem:[%s3559_s23 + $0x148] sm:$0xff]   ;;  %v3373_v60 = vld [vmem:[%s3559_s23 + $0x150] sm:$0xff]  }
  0x23   : > { %3022 = vmatpush3.bf16.msra.mxu0 %v3588_v7  ;;  %3070 = vmatpush3.bf16.msra.mxu1 %v3588_v7  ;;  %v3370_v57 = vld [vmem:[%s3559_s23 + $0x1c0] sm:$0xff]   ;;  %v3372_v59 = vld [vmem:[%s3559_s23 + $0x1c8] sm:$0xff]   ;;  %v3374_v61 = vld [vmem:[%s3559_s23 + $0x1d0] sm:$0xff]  }
  0x24   : > { %3023 = vmatprep.subr.bf16.mxu0 %v3597_v8  ;;  %3071 = vmatprep.subr.bf16.mxu1 %v3597_v8  ;;  %v3375_v62 = vld [vmem:[%s3559_s23 + $0x158] sm:$0xff]   ;;  %v3381_v4 = vld [vmem:[%s3559_s23 + $0x170] sm:$0xff]  }
  0x25   : > { %v3376_v63 = vld [vmem:[%s3559_s23 + $0x1d8] sm:$0xff]   ;;  %v3382_v5 = vld [vmem:[%s3559_s23 + $0x1f0] sm:$0xff]  }
  0x27   : > { %3024 = vmatpush3.bf16.msra.mxu0 %v3597_v8  ;;  %3072 = vmatpush3.bf16.msra.mxu1 %v3597_v8 }
  0x28   : > { %3025 = vmatprep.subr.bf16.mxu0 %v3606_v9  ;;  %3073 = vmatprep.subr.bf16.mxu1 %v3606_v9 }
  0x2b   : > { %3026 = vmatpush3.bf16.msra.mxu0 %v3606_v9  ;;  %3074 = vmatpush3.bf16.msra.mxu1 %v3606_v9 }
  0x2c   : > { %3107 = vmatprep.subr.bf16.mxu0 %v3313_v0  ;;  %3155 = vmatprep.subr.bf16.mxu1 %v3313_v0 }
  0x2e   : > { %3028 = vmatmul.mubr.bf16.vlgmr.msra.gmra.mrb[0].mxu0 %v3323_v10  ;;  %3076 = vmatmul.mubr.bf16.vlgmr.msra.gmra.mrb[0].mxu1 %v3324_v11 }
  0x2f   : > { %3108 = vmatpush3.bf16.msra.mxu0 %v3313_v0  ;;  %3156 = vmatpush3.bf16.msra.mxu1 %v3313_v0  ;;  %v3377_v0 = vld [vmem:[%s3559_s23 + $0x160] sm:$0xff]  }
  0x30   : > { %3031 = vmatprep.mubr.bf16.mxu0 %v3325_v12  ;;  %3079 = vmatprep.mubr.bf16.mxu1 %v3326_v13 }
  0x31   : > { %3109 = vmatprep.subr.bf16.mxu0 %v3547_v1  ;;  %3157 = vmatprep.subr.bf16.mxu1 %v3547_v1 }
  0x33   : > { %3110 = vmatpush3.bf16.msra.mxu0 %v3547_v1  ;;  %3158 = vmatpush3.bf16.msra.mxu1 %v3547_v1  ;;  %v3378_v1 = vld [vmem:[%s3559_s23 + $0x1e0] sm:$0xff]  }
  0x34   : > { %3111 = vmatprep.subr.bf16.mxu0 %v3554_v2  ;;  %3159 = vmatprep.subr.bf16.mxu1 %v3554_v2 }
  0x36   : > { %3032 = vmatmul.mubr.bf16.gmra.mrb[4].mxu0 %v3327_v14  ;;  %3080 = vmatmul.mubr.bf16.gmra.mrb[4].mxu1 %v3328_v15 }
  0x37   : > { %3035 = vmatprep.mubr.bf16.mxu0 %v3329_v16  ;;  %3083 = vmatprep.mubr.bf16.mxu1 %v3330_v17 }
  0x38   : > { %3112 = vmatpush3.bf16.msra.mxu0 %v3554_v2  ;;  %3160 = vmatpush3.bf16.msra.mxu1 %v3554_v2  ;;  %v3379_v2 = vld [vmem:[%s3559_s23 + $0x168] sm:$0xff]  }
  0x39   : > { %3113 = vmatprep.subr.bf16.mxu0 %v3566_v3  ;;  %3161 = vmatprep.subr.bf16.mxu1 %v3566_v3 }
  0x3c   : > { %3114 = vmatpush3.bf16.msra.mxu0 %v3566_v3  ;;  %3162 = vmatpush3.bf16.msra.mxu1 %v3566_v3  ;;  %v3380_v3 = vld [vmem:[%s3559_s23 + $0x1e8] sm:$0xff]  }
  0x3d   : > { %3115 = vmatprep.subr.bf16.mxu0 %v3579_v6  ;;  %3163 = vmatprep.subr.bf16.mxu1 %v3579_v6 }
  0x3e   : > { %3036 = vmatmul.mubr.bf16.gmra.mrb[8].mxu0 %v3331_v18  ;;  %3084 = vmatmul.mubr.bf16.gmra.mrb[8].mxu1 %v3332_v19 }
  0x3f   : > { %3039 = vmatprep.mubr.bf16.mxu0 %v3333_v20  ;;  %3087 = vmatprep.mubr.bf16.mxu1 %v3334_v21 }
  0x40   : > { %3116 = vmatpush3.bf16.msra.mxu0 %v3579_v6  ;;  %3164 = vmatpush3.bf16.msra.mxu1 %v3579_v6  ;;  %v3383_v6 = vld [vmem:[%s3559_s23 + $0x178] sm:$0xff]  }
  0x41   : > { %3117 = vmatprep.subr.bf16.mxu0 %v3588_v7  ;;  %3165 = vmatprep.subr.bf16.mxu1 %v3588_v7 }
  0x44   : > { %3118 = vmatpush3.bf16.msra.mxu0 %v3588_v7  ;;  %3166 = vmatpush3.bf16.msra.mxu1 %v3588_v7  ;;  %v3384_v7 = vld [vmem:[%s3559_s23 + $0x1f8] sm:$0xff]  }
  0x45   : > { %3119 = vmatprep.subr.bf16.mxu0 %v3597_v8  ;;  %3167 = vmatprep.subr.bf16.mxu1 %v3597_v8 }
  0x46   : > { %3040 = vmatmul.mubr.bf16.gmra.mrb[12].mxu0 %v3335_v22  ;;  %3088 = vmatmul.mubr.bf16.gmra.mrb[12].mxu1 %v3336_v23 }
  0x47   : > { %3043 = vmatprep.mubr.bf16.mxu0 %v3337_v24  ;;  %3091 = vmatprep.mubr.bf16.mxu1 %v3338_v25 }
  0x48   : > { %3120 = vmatpush3.bf16.msra.mxu0 %v3597_v8  ;;  %3168 = vmatpush3.bf16.msra.mxu1 %v3597_v8  ;;  %v3707_v8 = vld [vmem:[%s4057_s2] ss:$0 sm:$0xff] }
  0x49   : > { %3121 = vmatprep.subr.bf16.mxu0 %v3606_v9  ;;  %3169 = vmatprep.subr.bf16.mxu1 %v3606_v9 }
  0x4c   : > { %3122 = vmatpush3.bf16.msra.mxu0 %v3606_v9  ;;  %3170 = vmatpush3.bf16.msra.mxu1 %v3606_v9 }
  0x4e   : > { %3044 = vmatmul.mubr.bf16.gmra.mrb[16].mxu0 %v3339_v26  ;;  %3092 = vmatmul.mubr.bf16.gmra.mrb[16].mxu1 %v3340_v27 }
  0x4f   : > { %3047 = vmatprep.mubr.bf16.mxu0 %v3341_v28  ;;  %3095 = vmatprep.mubr.bf16.mxu1 %v3342_v29 }
  0x56   : > { %3048 = vmatmul.mubr.bf16.gmra.mrb[20].mxu0 %v3343_v30  ;;  %3096 = vmatmul.mubr.bf16.gmra.mrb[20].mxu1 %v3344_v31 }
  0x57   : > { %3051 = vmatprep.mubr.bf16.mxu0 %v3345_v32  ;;  %3099 = vmatprep.mubr.bf16.mxu1 %v3346_v33 }
  0x5e   : > { %3052 = vmatmul.mubr.bf16.gmra.mrb[24].mxu0 %v3347_v34  ;;  %3100 = vmatmul.mubr.bf16.gmra.mrb[24].mxu1 %v3348_v35 }
  0x5f   : > { %3055 = vmatprep.mubr.bf16.mxu0 %v3349_v36  ;;  %3103 = vmatprep.mubr.bf16.mxu1 %v3350_v37 }
  0x66   : > { %3056 = vmatmul.mubr.bf16.gmra.mrb[28].mxu0 %v3351_v38  ;;  %3104 = vmatmul.mubr.bf16.gmra.mrb[28].mxu1 %v3352_v39 }
  0x67   : > { %3123 = vmatprep.mubr.bf16.mxu0 %v3353_v40  ;;  %3171 = vmatprep.mubr.bf16.mxu1 %v3354_v41 }
  0x6e   : > { %3124 = vmatmul.mubr.bf16.vlgmr.msra.gmra.mrb[32].mxu0 %v3355_v42  ;;  %3172 = vmatmul.mubr.bf16.vlgmr.msra.gmra.mrb[32].mxu1 %v3356_v43 }
  0x6f   : > { %3127 = vmatprep.mubr.bf16.mxu0 %v3357_v44  ;;  %3175 = vmatprep.mubr.bf16.mxu1 %v3358_v45 }
  0x76   : > { %3128 = vmatmul.mubr.bf16.gmra.mrb[36].mxu0 %v3359_v46  ;;  %3176 = vmatmul.mubr.bf16.gmra.mrb[36].mxu1 %v3360_v47 }
  0x77   : > { %3131 = vmatprep.mubr.bf16.mxu0 %v3361_v48  ;;  %3179 = vmatprep.mubr.bf16.mxu1 %v3362_v49 }
  0x7e   : > { %3132 = vmatmul.mubr.bf16.gmra.mrb[40].mxu0 %v3363_v50  ;;  %3180 = vmatmul.mubr.bf16.gmra.mrb[40].mxu1 %v3364_v51 }
  0x7f   : > { %3135 = vmatprep.mubr.bf16.mxu0 %v3365_v52  ;;  %3183 = vmatprep.mubr.bf16.mxu1 %v3366_v53 }
  0x86   : > { %3136 = vmatmul.mubr.bf16.gmra.mrb[44].mxu0 %v3367_v54  ;;  %3184 = vmatmul.mubr.bf16.gmra.mrb[44].mxu1 %v3368_v55 }
  0x87   : > { %3139 = vmatprep.mubr.bf16.mxu0 %v3369_v56  ;;  %3187 = vmatprep.mubr.bf16.mxu1 %v3370_v57 }
  0x8e   : > { %3140 = vmatmul.mubr.bf16.gmra.mrb[48].mxu0 %v3371_v58  ;;  %3188 = vmatmul.mubr.bf16.gmra.mrb[48].mxu1 %v3372_v59 }
  0x8f   : > { %3143 = vmatprep.mubr.bf16.mxu0 %v3373_v60  ;;  %3191 = vmatprep.mubr.bf16.mxu1 %v3374_v61 }
  0x96   : > { %3144 = vmatmul.mubr.bf16.gmra.mrb[52].mxu0 %v3375_v62  ;;  %3192 = vmatmul.mubr.bf16.gmra.mrb[52].mxu1 %v3376_v63 }
  0x97   : > { %3147 = vmatprep.mubr.bf16.mxu0 %v3377_v0  ;;  %3195 = vmatprep.mubr.bf16.mxu1 %v3378_v1 }
  0x9e   : > { %3148 = vmatmul.mubr.bf16.gmra.mrb[56].mxu0 %v3379_v2  ;;  %3196 = vmatmul.mubr.bf16.gmra.mrb[56].mxu1 %v3380_v3 }
  0x9f   : > { %3151 = vmatprep.mubr.bf16.mxu0 %v3381_v4  ;;  %3199 = vmatprep.mubr.bf16.mxu1 %v3382_v5 }
  0xa6   : > { %3152 = vmatmul.mubr.bf16.gmra.mrb[60].mxu0 %v3383_v6  ;;  %3200 = vmatmul.mubr.bf16.gmra.mrb[60].mxu1 %v3384_v7 }
 0x101   : > { %v3029_v9 = vpop.f32.mrb[0].mxu0  ;;  %v3077_v10 = vpop.f32.mrb[0].mxu1 }
 0x102   : > { %v770_v11 = vpop.f32.mrb[1].mxu0  ;;  %v1129_v12 = vpop.f32.mrb[1].mxu1  ;;  %v779_v19 = vadd.f32 %v3029_v9, %v3707_v8  ;;  %v1138_v20 = vadd.f32 %v3077_v10, %v3707_v8 }
 0x103   : > { %v771_v13 = vadd.f32 %v3707_v8, %v770_v11  ;;  %v1130_v14 = vadd.f32 %v3707_v8, %v1129_v12  ;;  %v3030_v15 = vpop.f32.mrb[2].mxu0  ;;  %v3078_v16 = vpop.f32.mrb[2].mxu1 }
 0x104   : > { %v773_v17 = vpop.f32.mrb[3].mxu0  ;;  %v1132_v18 = vpop.f32.mrb[3].mxu1  ;;  %v782_v23 = vadd.f32 %v3030_v15, %v3707_v8  ;;  %v1141_v24 = vadd.f32 %v3078_v16, %v3707_v8  ;;  %v899_v29 = vmax.f32 %v779_v19, 0.0  ;;  %v1258_v30 = vmax.f32 %v1138_v20, 0.0 }
 0x105   : > { %v774_v21 = vadd.f32 %v3707_v8, %v773_v17  ;;  %v1133_v22 = vadd.f32 %v3707_v8, %v1132_v18  ;;  %v897_v25 = vmax.f32 %v771_v13, 0.0  ;;  %v1256_v26 = vmax.f32 %v1130_v14, 0.0 }
 0x106   : > { %v900_v35 = vmax.f32 %v782_v23, 0.0  ;;  %v1259_v36 = vmax.f32 %v1141_v24, 0.0 }
 0x107   : > { %v898_v27 = vmax.f32 %v774_v21, 0.0  ;;  %v1257_v28 = vmax.f32 %v1133_v22, 0.0 }
 0x109   : > { %v929_v31 = vadd.f32 %v898_v27, %v897_v25  ;;  %v1288_v32 = vadd.f32 %v1257_v28, %v1256_v26  ;;  %v3033_v33 = vpop.f32.mrb[4].mxu0  ;;  %v3081_v34 = vpop.f32.mrb[4].mxu1 }
 0x10a   : > { %v786_v37 = vpop.f32.mrb[5].mxu0  ;;  %v1145_v38 = vpop.f32.mrb[5].mxu1  ;;  %v795_v51 = vadd.f32 %v3033_v33, %v3707_v8  ;;  %v1154_v52 = vadd.f32 %v3081_v34, %v3707_v8 }
 0x10b   : > { %v930_v39 = vadd.f32 %v929_v31, %v899_v29  ;;  %v1289_v40 = vadd.f32 %v1288_v32, %v1258_v30  ;;  %v787_v41 = vadd.f32 %v3707_v8, %v786_v37  ;;  %v1146_v42 = vadd.f32 %v3707_v8, %v1145_v38  ;;  %v3034_v43 = vpop.f32.mrb[6].mxu0  ;;  %v3082_v44 = vpop.f32.mrb[6].mxu1 }
 0x10c   : > { %v789_v45 = vpop.f32.mrb[7].mxu0  ;;  %v1148_v46 = vpop.f32.mrb[7].mxu1  ;;  %v798_v57 = vadd.f32 %v3034_v43, %v3707_v8  ;;  %v1157_v58 = vadd.f32 %v3082_v44, %v3707_v8  ;;  %v903_v63 = vmax.f32 %v795_v51, 0.0  ;;  %v1262_v0 = vmax.f32 %v1154_v52, 0.0 }
 0x10d   : > { %v901_v47 = vmax.f32 %v787_v41, 0.0  ;;  %v931_v48 = vadd.f32 %v930_v39, %v900_v35  ;;  %v1260_v49 = vmax.f32 %v1146_v42, 0.0  ;;  %v1290_v50 = vadd.f32 %v1289_v40, %v1259_v36 }
 0x10e   : > { %v790_v53 = vadd.f32 %v3707_v8, %v789_v45  ;;  %v1149_v54 = vadd.f32 %v3707_v8, %v1148_v46  ;;  %v904_v10 = vmax.f32 %v798_v57, 0.0  ;;  %v1263_v11 = vmax.f32 %v1157_v58, 0.0 }
 0x10f   : > { %v932_v55 = vadd.f32 %v931_v48, %v901_v47  ;;  %v1291_v56 = vadd.f32 %v1290_v50, %v1260_v49 }
 0x110   : > { %v902_v59 = vmax.f32 %v790_v53, 0.0  ;;  %v1261_v60 = vmax.f32 %v1149_v54, 0.0 }
 0x111   : > { %v3037_v61 = vpop.f32.mrb[8].mxu0  ;;  %v3085_v62 = vpop.f32.mrb[8].mxu1 }
 0x112   : > { %v933_v1 = vadd.f32 %v932_v55, %v902_v59  ;;  %v1292_v2 = vadd.f32 %v1291_v56, %v1261_v60  ;;  %v802_v3 = vpop.f32.mrb[9].mxu0  ;;  %v1161_v4 = vpop.f32.mrb[9].mxu1  ;;  %v811_v16 = vadd.f32 %v3037_v61, %v3707_v8  ;;  %v1170_v17 = vadd.f32 %v3085_v62, %v3707_v8 }
 0x113   : > { %v803_v5 = vadd.f32 %v3707_v8, %v802_v3  ;;  %v1162_v6 = vadd.f32 %v3707_v8, %v1161_v4  ;;  %v3038_v7 = vpop.f32.mrb[10].mxu0  ;;  %v3086_v9 = vpop.f32.mrb[10].mxu1 }
 0x114   : > { %v934_v12 = vadd.f32 %v933_v1, %v903_v63  ;;  %v1293_v13 = vadd.f32 %v1292_v2, %v1262_v0  ;;  %v805_v14 = vpop.f32.mrb[11].mxu0  ;;  %v1164_v15 = vpop.f32.mrb[11].mxu1  ;;  %v814_v24 = vadd.f32 %v3038_v7, %v3707_v8  ;;  %v1173_v25 = vadd.f32 %v3086_v9, %v3707_v8 }
 0x115   : > { %v905_v18 = vmax.f32 %v803_v5, 0.0  ;;  %v1264_v19 = vmax.f32 %v1162_v6, 0.0  ;;  %v806_v22 = vadd.f32 %v3707_v8, %v805_v14  ;;  %v1165_v23 = vadd.f32 %v3707_v8, %v1164_v15 }
 0x116   : > { %v935_v20 = vadd.f32 %v934_v12, %v904_v10  ;;  %v1294_v21 = vadd.f32 %v1293_v13, %v1263_v11  ;;  %v907_v32 = vmax.f32 %v811_v16, 0.0  ;;  %v1266_v33 = vmax.f32 %v1170_v17, 0.0 }
 0x117   : > { %v906_v28 = vmax.f32 %v806_v22, 0.0  ;;  %v1265_v29 = vmax.f32 %v1165_v23, 0.0  ;;  %v908_v42 = vmax.f32 %v814_v24, 0.0  ;;  %v1267_v43 = vmax.f32 %v1173_v25, 0.0 }
 0x118   : > { %v936_v26 = vadd.f32 %v935_v20, %v905_v18  ;;  %v1295_v27 = vadd.f32 %v1294_v21, %v1264_v19 }
 0x119   : > { %v3041_v30 = vpop.f32.mrb[12].mxu0  ;;  %v3089_v31 = vpop.f32.mrb[12].mxu1 }
 0x11a   : > { %v937_v34 = vadd.f32 %v936_v26, %v906_v28  ;;  %v1296_v35 = vadd.f32 %v1295_v27, %v1265_v29  ;;  %v818_v36 = vpop.f32.mrb[13].mxu0  ;;  %v1177_v37 = vpop.f32.mrb[13].mxu1  ;;  %v827_v48 = vadd.f32 %v3041_v30, %v3707_v8  ;;  %v1186_v49 = vadd.f32 %v3089_v31, %v3707_v8 }
 0x11b   : > { %v819_v38 = vadd.f32 %v3707_v8, %v818_v36  ;;  %v1178_v39 = vadd.f32 %v3707_v8, %v1177_v37  ;;  %v3042_v40 = vpop.f32.mrb[14].mxu0  ;;  %v3090_v41 = vpop.f32.mrb[14].mxu1 }
 0x11c   : > { %v938_v44 = vadd.f32 %v937_v34, %v907_v32  ;;  %v1297_v45 = vadd.f32 %v1296_v35, %v1266_v33  ;;  %v821_v46 = vpop.f32.mrb[15].mxu0  ;;  %v1180_v47 = vpop.f32.mrb[15].mxu1  ;;  %v830_v56 = vadd.f32 %v3042_v40, %v3707_v8  ;;  %v1189_v57 = vadd.f32 %v3090_v41, %v3707_v8 }
 0x11d   : > { %v909_v50 = vmax.f32 %v819_v38, 0.0  ;;  %v1268_v51 = vmax.f32 %v1178_v39, 0.0  ;;  %v822_v54 = vadd.f32 %v3707_v8, %v821_v46  ;;  %v1181_v55 = vadd.f32 %v3707_v8, %v1180_v47 }
 0x11e   : > { %v939_v52 = vadd.f32 %v938_v44, %v908_v42  ;;  %v1298_v53 = vadd.f32 %v1297_v45, %v1267_v43  ;;  %v911_v0 = vmax.f32 %v827_v48, 0.0  ;;  %v1270_v1 = vmax.f32 %v1186_v49, 0.0 }
 0x11f   : > { %v910_v60 = vmax.f32 %v822_v54, 0.0  ;;  %v1269_v61 = vmax.f32 %v1181_v55, 0.0  ;;  %v912_v11 = vmax.f32 %v830_v56, 0.0  ;;  %v1271_v12 = vmax.f32 %v1189_v57, 0.0 }
 0x120   : > { %v940_v58 = vadd.f32 %v939_v52, %v909_v50  ;;  %v1299_v59 = vadd.f32 %v1298_v53, %v1268_v51 }
 0x121   : > { %v3045_v62 = vpop.f32.mrb[16].mxu0  ;;  %v3093_v63 = vpop.f32.mrb[16].mxu1 }
 0x122   : > { %v941_v2 = vadd.f32 %v940_v58, %v910_v60  ;;  %v1300_v3 = vadd.f32 %v1299_v59, %v1269_v61  ;;  %v834_v4 = vpop.f32.mrb[17].mxu0  ;;  %v1193_v5 = vpop.f32.mrb[17].mxu1  ;;  %v843_v17 = vadd.f32 %v3045_v62, %v3707_v8  ;;  %v1202_v18 = vadd.f32 %v3093_v63, %v3707_v8 }
 0x123   : > { %v835_v6 = vadd.f32 %v3707_v8, %v834_v4  ;;  %v1194_v7 = vadd.f32 %v3707_v8, %v1193_v5  ;;  %v3046_v9 = vpop.f32.mrb[18].mxu0  ;;  %v3094_v10 = vpop.f32.mrb[18].mxu1 }
 0x124   : > { %v942_v13 = vadd.f32 %v941_v2, %v911_v0  ;;  %v1301_v14 = vadd.f32 %v1300_v3, %v1270_v1  ;;  %v837_v15 = vpop.f32.mrb[19].mxu0  ;;  %v1196_v16 = vpop.f32.mrb[19].mxu1  ;;  %v846_v25 = vadd.f32 %v3046_v9, %v3707_v8  ;;  %v1205_v26 = vadd.f32 %v3094_v10, %v3707_v8 }
 0x125   : > { %v913_v19 = vmax.f32 %v835_v6, 0.0  ;;  %v1272_v20 = vmax.f32 %v1194_v7, 0.0  ;;  %v838_v23 = vadd.f32 %v3707_v8, %v837_v15  ;;  %v1197_v24 = vadd.f32 %v3707_v8, %v1196_v16 }
 0x126   : > { %v943_v21 = vadd.f32 %v942_v13, %v912_v11  ;;  %v1302_v22 = vadd.f32 %v1301_v14, %v1271_v12  ;;  %v915_v33 = vmax.f32 %v843_v17, 0.0  ;;  %v1274_v34 = vmax.f32 %v1202_v18, 0.0 }
 0x127   : > { %v914_v29 = vmax.f32 %v838_v23, 0.0  ;;  %v1273_v30 = vmax.f32 %v1197_v24, 0.0  ;;  %v916_v43 = vmax.f32 %v846_v25, 0.0  ;;  %v1275_v44 = vmax.f32 %v1205_v26, 0.0 }
 0x128   : > { %v944_v27 = vadd.f32 %v943_v21, %v913_v19  ;;  %v1303_v28 = vadd.f32 %v1302_v22, %v1272_v20 }
 0x129   : > { %v3049_v31 = vpop.f32.mrb[20].mxu0  ;;  %v3097_v32 = vpop.f32.mrb[20].mxu1 }
 0x12a   : > { %v945_v35 = vadd.f32 %v944_v27, %v914_v29  ;;  %v1304_v36 = vadd.f32 %v1303_v28, %v1273_v30  ;;  %v850_v37 = vpop.f32.mrb[21].mxu0  ;;  %v1209_v38 = vpop.f32.mrb[21].mxu1  ;;  %v859_v49 = vadd.f32 %v3049_v31, %v3707_v8  ;;  %v1218_v50 = vadd.f32 %v3097_v32, %v3707_v8 }
 0x12b   : > { %v851_v39 = vadd.f32 %v3707_v8, %v850_v37  ;;  %v1210_v40 = vadd.f32 %v3707_v8, %v1209_v38  ;;  %v3050_v41 = vpop.f32.mrb[22].mxu0  ;;  %v3098_v42 = vpop.f32.mrb[22].mxu1 }
 0x12c   : > { %v946_v45 = vadd.f32 %v945_v35, %v915_v33  ;;  %v1305_v46 = vadd.f32 %v1304_v36, %v1274_v34  ;;  %v853_v47 = vpop.f32.mrb[23].mxu0  ;;  %v1212_v48 = vpop.f32.mrb[23].mxu1  ;;  %v862_v57 = vadd.f32 %v3050_v41, %v3707_v8  ;;  %v1221_v58 = vadd.f32 %v3098_v42, %v3707_v8 }
 0x12d   : > { %v917_v51 = vmax.f32 %v851_v39, 0.0  ;;  %v1276_v52 = vmax.f32 %v1210_v40, 0.0  ;;  %v854_v55 = vadd.f32 %v3707_v8, %v853_v47  ;;  %v1213_v56 = vadd.f32 %v3707_v8, %v1212_v48 }
 0x12e   : > { %v947_v53 = vadd.f32 %v946_v45, %v916_v43  ;;  %v1306_v54 = vadd.f32 %v1305_v46, %v1275_v44  ;;  %v919_v1 = vmax.f32 %v859_v49, 0.0  ;;  %v1278_v2 = vmax.f32 %v1218_v50, 0.0 }
 0x12f   : > { %v918_v61 = vmax.f32 %v854_v55, 0.0  ;;  %v1277_v62 = vmax.f32 %v1213_v56, 0.0  ;;  %v920_v12 = vmax.f32 %v862_v57, 0.0  ;;  %v1279_v13 = vmax.f32 %v1221_v58, 0.0 }
 0x130   : > { %v948_v59 = vadd.f32 %v947_v53, %v917_v51  ;;  %v1307_v60 = vadd.f32 %v1306_v54, %v1276_v52 }
 0x131   : > { %v3053_v63 = vpop.f32.mrb[24].mxu0  ;;  %v3101_v0 = vpop.f32.mrb[24].mxu1 }
 0x132   : > { %v949_v3 = vadd.f32 %v948_v59, %v918_v61  ;;  %v1308_v4 = vadd.f32 %v1307_v60, %v1277_v62  ;;  %v866_v5 = vpop.f32.mrb[25].mxu0  ;;  %v1225_v6 = vpop.f32.mrb[25].mxu1  ;;  %v875_v18 = vadd.f32 %v3053_v63, %v3707_v8  ;;  %v1234_v19 = vadd.f32 %v3101_v0, %v3707_v8 }
 0x133   : > { %v867_v7 = vadd.f32 %v3707_v8, %v866_v5  ;;  %v1226_v9 = vadd.f32 %v3707_v8, %v1225_v6  ;;  %v3054_v10 = vpop.f32.mrb[26].mxu0  ;;  %v3102_v11 = vpop.f32.mrb[26].mxu1 }
 0x134   : > { %v950_v14 = vadd.f32 %v949_v3, %v919_v1  ;;  %v1309_v15 = vadd.f32 %v1308_v4, %v1278_v2  ;;  %v869_v16 = vpop.f32.mrb[27].mxu0  ;;  %v1228_v17 = vpop.f32.mrb[27].mxu1  ;;  %v878_v26 = vadd.f32 %v3054_v10, %v3707_v8  ;;  %v1237_v27 = vadd.f32 %v3102_v11, %v3707_v8 }
 0x135   : > { %v921_v20 = vmax.f32 %v867_v7, 0.0  ;;  %v1280_v21 = vmax.f32 %v1226_v9, 0.0  ;;  %v870_v24 = vadd.f32 %v3707_v8, %v869_v16  ;;  %v1229_v25 = vadd.f32 %v3707_v8, %v1228_v17 }
 0x136   : > { %v951_v22 = vadd.f32 %v950_v14, %v920_v12  ;;  %v1310_v23 = vadd.f32 %v1309_v15, %v1279_v13  ;;  %v923_v34 = vmax.f32 %v875_v18, 0.0  ;;  %v1282_v35 = vmax.f32 %v1234_v19, 0.0 }
 0x137   : > { %v922_v30 = vmax.f32 %v870_v24, 0.0  ;;  %v1281_v31 = vmax.f32 %v1229_v25, 0.0  ;;  %v924_v44 = vmax.f32 %v878_v26, 0.0  ;;  %v1283_v45 = vmax.f32 %v1237_v27, 0.0 }
 0x138   : > { %v952_v28 = vadd.f32 %v951_v22, %v921_v20  ;;  %v1311_v29 = vadd.f32 %v1310_v23, %v1280_v21 }
 0x139   : > { %v3057_v32 = vpop.f32.mrb[28].mxu0  ;;  %v3105_v33 = vpop.f32.mrb[28].mxu1 }
 0x13a   : > { %v953_v36 = vadd.f32 %v952_v28, %v922_v30  ;;  %v1312_v37 = vadd.f32 %v1311_v29, %v1281_v31  ;;  %v882_v38 = vpop.f32.mrb[29].mxu0  ;;  %v1241_v39 = vpop.f32.mrb[29].mxu1  ;;  %v891_v50 = vadd.f32 %v3057_v32, %v3707_v8  ;;  %v1250_v51 = vadd.f32 %v3105_v33, %v3707_v8 }
 0x13b   : > { %v883_v40 = vadd.f32 %v3707_v8, %v882_v38  ;;  %v1242_v41 = vadd.f32 %v3707_v8, %v1241_v39  ;;  %v3058_v42 = vpop.f32.mrb[30].mxu0  ;;  %v3106_v43 = vpop.f32.mrb[30].mxu1 }
 0x13c   : > { %v954_v46 = vadd.f32 %v953_v36, %v923_v34  ;;  %v1313_v47 = vadd.f32 %v1312_v37, %v1282_v35  ;;  %v885_v48 = vpop.f32.mrb[31].mxu0  ;;  %v1244_v49 = vpop.f32.mrb[31].mxu1  ;;  %v894_v58 = vadd.f32 %v3058_v42, %v3707_v8  ;;  %v1253_v59 = vadd.f32 %v3106_v43, %v3707_v8 }
 0x13d   : > { %v925_v52 = vmax.f32 %v883_v40, 0.0  ;;  %v1284_v53 = vmax.f32 %v1242_v41, 0.0  ;;  %v886_v56 = vadd.f32 %v3707_v8, %v885_v48  ;;  %v1245_v57 = vadd.f32 %v3707_v8, %v1244_v49 }
 0x13e   : > { %v955_v54 = vadd.f32 %v954_v46, %v924_v44  ;;  %v1314_v55 = vadd.f32 %v1313_v47, %v1283_v45  ;;  %v927_v2 = vmax.f32 %v891_v50, 0.0  ;;  %v1286_v3 = vmax.f32 %v1250_v51, 0.0 }
 0x13f   : > { %v926_v62 = vmax.f32 %v886_v56, 0.0  ;;  %v1285_v63 = vmax.f32 %v1245_v57, 0.0  ;;  %v928_v13 = vmax.f32 %v894_v58, 0.0  ;;  %v1287_v14 = vmax.f32 %v1253_v59, 0.0 }
 0x140   : > { %v956_v60 = vadd.f32 %v955_v54, %v925_v52  ;;  %v1315_v61 = vadd.f32 %v1314_v55, %v1284_v53 }
 0x141   : > { %v3125_v0 = vpop.f32.mrb[32].mxu0  ;;  %v3173_v1 = vpop.f32.mrb[32].mxu1 }
 0x142   : > { %v957_v4 = vadd.f32 %v956_v60, %v926_v62  ;;  %v1316_v5 = vadd.f32 %v1315_v61, %v1285_v63  ;;  %v1488_v6 = vpop.f32.mrb[33].mxu0  ;;  %v1847_v7 = vpop.f32.mrb[33].mxu1  ;;  %v1497_v19 = vadd.f32 %v3125_v0, %v3707_v8  ;;  %v1856_v20 = vadd.f32 %v3173_v1, %v3707_v8 }
 0x143   : > { %v1489_v9 = vadd.f32 %v3707_v8, %v1488_v6  ;;  %v1848_v10 = vadd.f32 %v3707_v8, %v1847_v7  ;;  %v3126_v11 = vpop.f32.mrb[34].mxu0  ;;  %v3174_v12 = vpop.f32.mrb[34].mxu1 }
 0x144   : > { %v958_v15 = vadd.f32 %v957_v4, %v927_v2  ;;  %v1317_v16 = vadd.f32 %v1316_v5, %v1286_v3  ;;  %v1491_v17 = vpop.f32.mrb[35].mxu0  ;;  %v1850_v18 = vpop.f32.mrb[35].mxu1  ;;  %v1500_v27 = vadd.f32 %v3126_v11, %v3707_v8  ;;  %v1859_v28 = vadd.f32 %v3174_v12, %v3707_v8 }
 0x145   : > { %v1492_v23 = vadd.f32 %v3707_v8, %v1491_v17  ;;  %v1851_v24 = vadd.f32 %v3707_v8, %v1850_v18  ;;  %v1615_v25 = vmax.f32 %v1489_v9, 0.0  ;;  %v1974_v26 = vmax.f32 %v1848_v10, 0.0 }
 0x146   : > { %v959_v21 = vadd.f32 %v958_v15, %v928_v13  ;;  %v1318_v22 = vadd.f32 %v1317_v16, %v1287_v14  ;;  %v1617_v33 = vmax.f32 %v1497_v19, 0.0  ;;  %v1976_v34 = vmax.f32 %v1856_v20, 0.0 }
 0x147   : > { %v1616_v31 = vmax.f32 %v1492_v23, 0.0  ;;  %v1975_v32 = vmax.f32 %v1851_v24, 0.0  ;;  %v1618_v43 = vmax.f32 %v1500_v27, 0.0  ;;  %v1977_v44 = vmax.f32 %v1859_v28, 0.0 }
 0x148   : > { %v960_v29 = vrot.slane %v959_v21, 4  ;;  %v1319_v30 = vrot.slane %v1318_v22, 4 }
 0x149   : > { %v3129_v35 = vpop.f32.mrb[36].mxu0  ;;  %v3177_v36 = vpop.f32.mrb[36].mxu1  ;;  %v1647_v39 = vadd.f32 %v1616_v31, %v1615_v25  ;;  %v2006_v40 = vadd.f32 %v1975_v32, %v1974_v26 }
 0x14a   : > { %v961_v37 = vadd.f32 %v960_v29, %v959_v21  ;;  %v1320_v38 = vadd.f32 %v1319_v30, %v1318_v22  ;;  %v1504_v41 = vpop.f32.mrb[37].mxu0  ;;  %v1863_v42 = vpop.f32.mrb[37].mxu1  ;;  %v1513_v55 = vadd.f32 %v3129_v35, %v3707_v8  ;;  %v1872_v56 = vadd.f32 %v3177_v36, %v3707_v8 }
 0x14b   : > { %v1505_v45 = vadd.f32 %v3707_v8, %v1504_v41  ;;  %v1864_v46 = vadd.f32 %v3707_v8, %v1863_v42  ;;  %v3130_v47 = vpop.f32.mrb[38].mxu0  ;;  %v3178_v48 = vpop.f32.mrb[38].mxu1  ;;  %v1648_v51 = vadd.f32 %v1647_v39, %v1617_v33  ;;  %v2007_v52 = vadd.f32 %v2006_v40, %v1976_v34 }
 0x14c   : > { %v962_v49 = vrot.slane %v961_v37, 2  ;;  %v1321_v50 = vrot.slane %v1320_v38, 2  ;;  %v1507_v53 = vpop.f32.mrb[39].mxu0  ;;  %v1866_v54 = vpop.f32.mrb[39].mxu1  ;;  %v1516_v63 = vadd.f32 %v3130_v47, %v3707_v8  ;;  %v1875_v0 = vadd.f32 %v3178_v48, %v3707_v8 }
 0x14d   : > { %v1619_v57 = vmax.f32 %v1505_v45, 0.0  ;;  %v1978_v58 = vmax.f32 %v1864_v46, 0.0  ;;  %v1649_v61 = vadd.f32 %v1648_v51, %v1618_v43  ;;  %v2008_v62 = vadd.f32 %v2007_v52, %v1977_v44 }
 0x14e   : > { %v963_v59 = vadd.f32 %v962_v49, %v961_v37  ;;  %v1322_v60 = vadd.f32 %v1321_v50, %v1320_v38  ;;  %v1508_v1 = vadd.f32 %v3707_v8, %v1507_v53  ;;  %v1867_v2 = vadd.f32 %v3707_v8, %v1866_v54 }
 0x14f   : > { %v1650_v5 = vadd.f32 %v1649_v61, %v1619_v57  ;;  %v2009_v6 = vadd.f32 %v2008_v62, %v1978_v58  ;;  %v1621_v14 = vmax.f32 %v1513_v55, 0.0  ;;  %v1980_v15 = vmax.f32 %v1872_v56, 0.0 }
 0x150   : > { %v964_v3 = vrot.slane %v963_v59, 1  ;;  %v1323_v4 = vrot.slane %v1322_v60, 1  ;;  %v1620_v7 = vmax.f32 %v1508_v1, 0.0  ;;  %v1979_v9 = vmax.f32 %v1867_v2, 0.0 }
 0x151   : > { %v3133_v10 = vpop.f32.mrb[40].mxu0  ;;  %v3181_v11 = vpop.f32.mrb[40].mxu1  ;;  %v1622_v26 = vmax.f32 %v1516_v63, 0.0  ;;  %v1981_v27 = vmax.f32 %v1875_v0, 0.0 }
 0x152   : > { %v965_v12 = vadd.f32 %v964_v3, %v963_v59  ;;  %v1324_v13 = vadd.f32 %v1323_v4, %v1322_v60  ;;  %v1520_v16 = vpop.f32.mrb[41].mxu0  ;;  %v1879_v17 = vpop.f32.mrb[41].mxu1  ;;  %v1651_v18 = vadd.f32 %v1650_v5, %v1620_v7  ;;  %v2010_v19 = vadd.f32 %v2009_v6, %v1979_v9 }
 0x153   : > { %v1521_v20 = vadd.f32 %v3707_v8, %v1520_v16  ;;  %v1880_v21 = vadd.f32 %v3707_v8, %v1879_v17  ;;  %v3134_v22 = vpop.f32.mrb[42].mxu0  ;;  %v3182_v23 = vpop.f32.mrb[42].mxu1  ;;  %v1529_v35 = vadd.f32 %v3133_v10, %v3707_v8  ;;  %v1888_v36 = vadd.f32 %v3181_v11, %v3707_v8 }
 0x154   : > { %v966_v24 = vmul.f32 0.00390625, %v965_v12  ;;  %v1325_v25 = vmul.f32 0.00390625, %v1324_v13  ;;  %v1523_v28 = vpop.f32.mrb[43].mxu0  ;;  %v1882_v29 = vpop.f32.mrb[43].mxu1  ;;  %v1652_v30 = vadd.f32 %v1651_v18, %v1621_v14  ;;  %v2011_v31 = vadd.f32 %v2010_v19, %v1980_v15 }
 0x155   : > { %v1623_v32 = vmax.f32 %v1521_v20, 0.0  ;;  %v1982_v33 = vmax.f32 %v1880_v21, 0.0  ;;  %v1524_v37 = vadd.f32 %v3707_v8, %v1523_v28  ;;  %v1883_v40 = vadd.f32 %v3707_v8, %v1882_v29 }
 0x156   : > { %v3792_v34 = vsel %vm2044_vm0, %v966_v24, %v1325_v25  ;;  %v1653_v38 = vadd.f32 %v1652_v30, %v1622_v26  ;;  %v2012_v39 = vadd.f32 %v2011_v31, %v1981_v27  ;;  %v1532_v41 = vadd.f32 %v3134_v22, %v3707_v8 }
 0x157   : > { %v1891_v42 = vadd.f32 %v3182_v23, %v3707_v8  ;;  %v1624_v43 = vmax.f32 %v1524_v37, 0.0  ;;  %v1983_v46 = vmax.f32 %v1883_v40, 0.0  ;;  %v1625_v49 = vmax.f32 %v1529_v35, 0.0 }
 0x158   : > { %v1654_v44 = vadd.f32 %v1653_v38, %v1623_v32  ;;  %v2013_v45 = vadd.f32 %v2012_v39, %v1982_v33  ;;  %v1984_v50 = vmax.f32 %v1888_v36, 0.0  ;;  %v1626_v59 = vmax.f32 %v1532_v41, 0.0 }
 0x159   : > { %v3137_v47 = vpop.f32.mrb[44].mxu0  ;;  %v3185_v48 = vpop.f32.mrb[44].mxu1  ;;  %v1985_v60 = vmax.f32 %v1891_v42, 0.0 }
 0x15a   : > { %v1536_v51 = vpop.f32.mrb[45].mxu0  ;;  %v1895_v52 = vpop.f32.mrb[45].mxu1  ;;  %v1655_v53 = vadd.f32 %v1654_v44, %v1624_v43  ;;  %v2014_v54 = vadd.f32 %v2013_v45, %v1983_v46  ;;  %v1545_v3 = vadd.f32 %v3137_v47, %v3707_v8  ;;  %v1904_v4 = vadd.f32 %v3185_v48, %v3707_v8 }
 0x15b   : > { %v1537_v55 = vadd.f32 %v3707_v8, %v1536_v51  ;;  %v1896_v56 = vadd.f32 %v3707_v8, %v1895_v52  ;;  %v3138_v57 = vpop.f32.mrb[46].mxu0  ;;  %v3186_v58 = vpop.f32.mrb[46].mxu1 }
 0x15c   : > { %v1539_v61 = vpop.f32.mrb[47].mxu0  ;;  %v1898_v62 = vpop.f32.mrb[47].mxu1  ;;  %v1656_v63 = vadd.f32 %v1655_v53, %v1625_v49  ;;  %v2015_v0 = vadd.f32 %v2014_v54, %v1984_v50  ;;  %v1548_v10 = vadd.f32 %v3138_v57, %v3707_v8  ;;  %v1907_v11 = vadd.f32 %v3186_v58, %v3707_v8 }
 0x15d   : > { %v1627_v1 = vmax.f32 %v1537_v55, 0.0  ;;  %v1986_v2 = vmax.f32 %v1896_v56, 0.0  ;;  %v1540_v5 = vadd.f32 %v3707_v8, %v1539_v61  ;;  %v1899_v6 = vadd.f32 %v3707_v8, %v1898_v62 }
 0x15e   : > { %v1657_v7 = vadd.f32 %v1656_v63, %v1626_v59  ;;  %v2016_v9 = vadd.f32 %v2015_v0, %v1985_v60  ;;  %v1629_v18 = vmax.f32 %v1545_v3, 0.0  ;;  %v1988_v19 = vmax.f32 %v1904_v4, 0.0 }
 0x15f   : > { %v1628_v12 = vmax.f32 %v1540_v5, 0.0  ;;  %v1987_v13 = vmax.f32 %v1899_v6, 0.0  ;;  %v1630_v28 = vmax.f32 %v1548_v10, 0.0  ;;  %v1989_v29 = vmax.f32 %v1907_v11, 0.0 }
 0x160   : > { %v1658_v14 = vadd.f32 %v1657_v7, %v1627_v1  ;;  %v2017_v15 = vadd.f32 %v2016_v9, %v1986_v2 }
 0x161   : > { %v3141_v16 = vpop.f32.mrb[48].mxu0  ;;  %v3189_v17 = vpop.f32.mrb[48].mxu1 }
 0x162   : > { %v1552_v20 = vpop.f32.mrb[49].mxu0  ;;  %v1911_v21 = vpop.f32.mrb[49].mxu1  ;;  %v1659_v22 = vadd.f32 %v1658_v14, %v1628_v12  ;;  %v2018_v23 = vadd.f32 %v2017_v15, %v1987_v13  ;;  %v1561_v37 = vadd.f32 %v3141_v16, %v3707_v8  ;;  %v1920_v38 = vadd.f32 %v3189_v17, %v3707_v8 }
 0x163   : > { %v1553_v24 = vadd.f32 %v3707_v8, %v1552_v20  ;;  %v1912_v25 = vadd.f32 %v3707_v8, %v1911_v21  ;;  %v3142_v26 = vpop.f32.mrb[50].mxu0  ;;  %v3190_v27 = vpop.f32.mrb[50].mxu1 }
 0x164   : > { %v1555_v30 = vpop.f32.mrb[51].mxu0  ;;  %v1914_v31 = vpop.f32.mrb[51].mxu1  ;;  %v1660_v32 = vadd.f32 %v1659_v22, %v1629_v18  ;;  %v2019_v33 = vadd.f32 %v2018_v23, %v1988_v19  ;;  %v1564_v43 = vadd.f32 %v3142_v26, %v3707_v8  ;;  %v1923_v44 = vadd.f32 %v3190_v27, %v3707_v8 }
 0x165   : > { %v1631_v35 = vmax.f32 %v1553_v24, 0.0  ;;  %v1990_v36 = vmax.f32 %v1912_v25, 0.0  ;;  %v1556_v39 = vadd.f32 %v3707_v8, %v1555_v30  ;;  %v1915_v40 = vadd.f32 %v3707_v8, %v1914_v31 }
 0x166   : > { %v1661_v41 = vadd.f32 %v1660_v32, %v1630_v28  ;;  %v2020_v42 = vadd.f32 %v2019_v33, %v1989_v29  ;;  %v1633_v51 = vmax.f32 %v1561_v37, 0.0  ;;  %v1992_v52 = vmax.f32 %v1920_v38, 0.0 }
 0x167   : > { %v1632_v45 = vmax.f32 %v1556_v39, 0.0  ;;  %v1991_v46 = vmax.f32 %v1915_v40, 0.0  ;;  %v1634_v61 = vmax.f32 %v1564_v43, 0.0  ;;  %v1993_v62 = vmax.f32 %v1923_v44, 0.0 }
 0x168   : > { %v1662_v47 = vadd.f32 %v1661_v41, %v1631_v35  ;;  %v2021_v48 = vadd.f32 %v2020_v42, %v1990_v36 }
 0x169   : > { %v3145_v49 = vpop.f32.mrb[52].mxu0  ;;  %v3193_v50 = vpop.f32.mrb[52].mxu1 }
 0x16a   : > { %v1568_v53 = vpop.f32.mrb[53].mxu0  ;;  %v1927_v54 = vpop.f32.mrb[53].mxu1  ;;  %v1663_v55 = vadd.f32 %v1662_v47, %v1632_v45  ;;  %v2022_v56 = vadd.f32 %v2021_v48, %v1991_v46  ;;  %v1577_v5 = vadd.f32 %v3145_v49, %v3707_v8  ;;  %v1936_v6 = vadd.f32 %v3193_v50, %v3707_v8 }
 0x16b   : > { %v1569_v57 = vadd.f32 %v3707_v8, %v1568_v53  ;;  %v1928_v58 = vadd.f32 %v3707_v8, %v1927_v54  ;;  %v3146_v59 = vpop.f32.mrb[54].mxu0  ;;  %v3194_v60 = vpop.f32.mrb[54].mxu1 }
 0x16c   : > { %v1571_v63 = vpop.f32.mrb[55].mxu0  ;;  %v1930_v0 = vpop.f32.mrb[55].mxu1  ;;  %v1664_v1 = vadd.f32 %v1663_v55, %v1633_v51  ;;  %v2023_v2 = vadd.f32 %v2022_v56, %v1992_v52  ;;  %v1580_v12 = vadd.f32 %v3146_v59, %v3707_v8  ;;  %v1939_v13 = vadd.f32 %v3194_v60, %v3707_v8 }
 0x16d   : > { %v1635_v3 = vmax.f32 %v1569_v57, 0.0  ;;  %v1994_v4 = vmax.f32 %v1928_v58, 0.0  ;;  %v1572_v7 = vadd.f32 %v3707_v8, %v1571_v63  ;;  %v1931_v9 = vadd.f32 %v3707_v8, %v1930_v0 }
 0x16e   : > { %v1665_v10 = vadd.f32 %v1664_v1, %v1634_v61  ;;  %v2024_v11 = vadd.f32 %v2023_v2, %v1993_v62  ;;  %v1637_v20 = vmax.f32 %v1577_v5, 0.0  ;;  %v1996_v21 = vmax.f32 %v1936_v6, 0.0 }
 0x16f   : > { %v1636_v14 = vmax.f32 %v1572_v7, 0.0  ;;  %v1995_v15 = vmax.f32 %v1931_v9, 0.0  ;;  %v1638_v30 = vmax.f32 %v1580_v12, 0.0  ;;  %v1997_v31 = vmax.f32 %v1939_v13, 0.0 }
 0x170   : > { %v1666_v16 = vadd.f32 %v1665_v10, %v1635_v3  ;;  %v2025_v17 = vadd.f32 %v2024_v11, %v1994_v4 }
 0x171   : > { %v3149_v18 = vpop.f32.mrb[56].mxu0  ;;  %v3197_v19 = vpop.f32.mrb[56].mxu1 }
 0x172   : > { %v1584_v22 = vpop.f32.mrb[57].mxu0  ;;  %v1943_v23 = vpop.f32.mrb[57].mxu1  ;;  %v1667_v24 = vadd.f32 %v1666_v16, %v1636_v14  ;;  %v2026_v25 = vadd.f32 %v2025_v17, %v1995_v15  ;;  %v1593_v39 = vadd.f32 %v3149_v18, %v3707_v8  ;;  %v1952_v40 = vadd.f32 %v3197_v19, %v3707_v8  ;;  %v3385_v18 = vld [vmem:[%s4057_s2] ss:$0 sm:$0xff] }
 0x173   : > { %v1585_v26 = vadd.f32 %v3707_v8, %v1584_v22  ;;  %v1944_v27 = vadd.f32 %v3707_v8, %v1943_v23  ;;  %v3150_v28 = vpop.f32.mrb[58].mxu0  ;;  %v3198_v29 = vpop.f32.mrb[58].mxu1 }
 0x174   : > { %v1587_v32 = vpop.f32.mrb[59].mxu0  ;;  %v1946_v33 = vpop.f32.mrb[59].mxu1  ;;  %v1668_v35 = vadd.f32 %v1667_v24, %v1637_v20  ;;  %v2027_v36 = vadd.f32 %v2026_v25, %v1996_v21  ;;  %v1596_v45 = vadd.f32 %v3150_v28, %v3707_v8  ;;  %v1955_v46 = vadd.f32 %v3198_v29, %v3707_v8 }
 0x175   : > { %v1639_v37 = vmax.f32 %v1585_v26, 0.0  ;;  %v1998_v38 = vmax.f32 %v1944_v27, 0.0  ;;  %v1588_v41 = vadd.f32 %v3707_v8, %v1587_v32  ;;  %v1947_v42 = vadd.f32 %v3707_v8, %v1946_v33 }
 0x176   : > { %v1669_v43 = vadd.f32 %v1668_v35, %v1638_v30  ;;  %v2028_v44 = vadd.f32 %v2027_v36, %v1997_v31  ;;  %v1641_v53 = vmax.f32 %v1593_v39, 0.0  ;;  %v2000_v54 = vmax.f32 %v1952_v40, 0.0 }
 0x177   : > { %v1640_v47 = vmax.f32 %v1588_v41, 0.0  ;;  %v1999_v48 = vmax.f32 %v1947_v42, 0.0  ;;  %v1642_v63 = vmax.f32 %v1596_v45, 0.0  ;;  %v2001_v0 = vmax.f32 %v1955_v46, 0.0 }
 0x178   : > { %v1670_v49 = vadd.f32 %v1669_v43, %v1639_v37  ;;  %v2029_v50 = vadd.f32 %v2028_v44, %v1998_v38 }
 0x179   : > { %v3153_v51 = vpop.f32.mrb[60].mxu0  ;;  %v3201_v52 = vpop.f32.mrb[60].mxu1 }
 0x17a   : > { %v1600_v55 = vpop.f32.mrb[61].mxu0  ;;  %v1959_v56 = vpop.f32.mrb[61].mxu1  ;;  %v1671_v57 = vadd.f32 %v1670_v49, %v1640_v47  ;;  %v2030_v58 = vadd.f32 %v2029_v50, %v1999_v48  ;;  %v1609_v10 = vadd.f32 %v3153_v51, %v3707_v8  ;;  %v1968_v11 = vadd.f32 %v3201_v52, %v3707_v8  ;;  %v3386_v47 = vld [vmem:[%s4058_s3] sm:$0xff] (!%p2817_p4)   ;;  %v3388_v49 = vld [vmem:[%s4058_s3 + $0x10] sm:$0xff] (!%p2817_p4)   ;;  %v3389_v51 = vld [vmem:[%s4058_s3 + $0x18] sm:$0xff] (!%p2817_p4)  }
 0x17b   : > { %v1601_v59 = vadd.f32 %v3707_v8, %v1600_v55  ;;  %v1960_v60 = vadd.f32 %v3707_v8, %v1959_v56  ;;  %v3154_v61 = vpop.f32.mrb[62].mxu0  ;;  %v3202_v62 = vpop.f32.mrb[62].mxu1  ;;  %v3438_v48 = vmov (!%p2817_p4), 0.0   ;;  %v3394_v50 = vld [vmem:[%s4060_s5] sm:$0xff] (!%p2817_p4)   ;;  %v3395_v52 = vld [vmem:[%s4060_s5 + $0x8] sm:$0xff] (!%p2817_p4)   ;;  %v3396_v56 = vld [vmem:[%s4060_s5 + $0x10] sm:$0xff] (!%p2817_p4)  }
 0x17c   : > { %v1603_v1 = vpop.f32.mrb[63].mxu0  ;;  %v1962_v2 = vpop.f32.mrb[63].mxu1  ;;  %v1672_v3 = vadd.f32 %v1671_v57, %v1641_v53  ;;  %v2031_v4 = vadd.f32 %v2030_v58, %v2000_v54  ;;  %v1612_v19 = vadd.f32 %v3385_v18, %v3154_v61  ;;  %v1971_v20 = vadd.f32 %v3385_v18, %v3202_v62  ;;  %3203 = vmatprep.subr.bf16.mxu0 (!%p2817_p4), %v3438_v48  ;;  %v3390_v54 = vld [vmem:[%s4058_s3 + $0x20] sm:$0xff] (!%p2817_p4)   ;;  %v3391_v57 = vld [vmem:[%s4058_s3 + $0x28] sm:$0xff] (!%p2817_p4)   ;;  %v3397_v58 = vld [vmem:[%s4060_s5 + $0x18] sm:$0xff] (!%p2817_p4)  }
 0x17d   : > { %v1643_v5 = vmax.f32 %v1601_v59, 0.0  ;;  %v2002_v6 = vmax.f32 %v1960_v60, 0.0  ;;  %v1604_v7 = vadd.f32 %v3707_v8, %v1603_v1  ;;  %v1963_v9 = vadd.f32 %v3707_v8, %v1962_v2  ;;  %3223 = vmatprep.subr.bf16.mxu1 (!%p2817_p4), %v3438_v48  ;;  %3204 = vmatpush3.bf16.msra.mxu0 (!%p2817_p4), %v3386_v47  ;;  %v3392_v59 = vld [vmem:[%s4058_s3 + $0x30] sm:$0xff] (!%p2817_p4)   ;;  %v3398_v61 = vld [vmem:[%s4060_s5 + $0x20] sm:$0xff] (!%p2817_p4)   ;;  %v3393_v62 = vld [vmem:[%s4058_s3 + $0x38] sm:$0xff] (!%p2817_p4)  }
 0x17e   : > { %v1673_v12 = vadd.f32 %v1672_v3, %v1642_v63  ;;  %v2032_v13 = vadd.f32 %v2031_v4, %v2001_v0  ;;  %v1645_v21 = vmax.f32 %v1609_v10, 0.0  ;;  %v2004_v22 = vmax.f32 %v1968_v11, 0.0  ;;  %3219 = vmatprep.mubr.msk.bf16.mxu0 (!%p2817_p4), %vm3439_vm3, %v3438_v48  ;;  %3205 = vmatprep.subr.bf16.mxu0 (!%p2817_p4), %v3438_v48  ;;  %v3399_v63 = vld [vmem:[%s4060_s5 + $0x28] sm:$0xff] (!%p2817_p4)   ;;  %v3400_v2 = vld [vmem:[%s4060_s5 + $0x30] sm:$0xff] (!%p2817_p4)   ;;  %v3401_v3 = vld [vmem:[%s4060_s5 + $0x38] sm:$0xff] (!%p2817_p4)  }
 0x17f   : > { %v1644_v14 = vmax.f32 %v1604_v7, 0.0  ;;  %v2003_v15 = vmax.f32 %v1963_v9, 0.0  ;;  %v1646_v25 = vmax.f32 %v1612_v19, 0.0  ;;  %v2005_v26 = vmax.f32 %v1971_v20, 0.0  ;;  %3239 = vmatprep.mubr.msk.bf16.mxu1 (!%p2817_p4), %vm3439_vm3, %v3438_v48  ;;  %3224 = vmatpush3.bf16.msra.mxu1 (!%p2817_p4), %v3394_v50  ;;  %v2819_v4 = vld [vmem:[%s4059_s4] ss:$0 sm:$0xff] (!%p2817_p4) }
 0x180   : > { %v1674_v16 = vadd.f32 %v1673_v12, %v1643_v5  ;;  %v2033_v17 = vadd.f32 %v2032_v13, %v2002_v6  ;;  %3225 = vmatprep.subr.bf16.mxu1 (!%p2817_p4), %v3438_v48  ;;  %v3402_v12 = vld [vmem:[%s4064_s9] sm:$0xff] (!%p2817_p4)   ;;  %v3403_v13 = vld [vmem:[%s4064_s9 + $0x8] sm:$0xff] (!%p2817_p4)   ;;  %v3408_v18 = vld [vmem:[%s4064_s9 + $0x30] sm:$0xff] (!%p2817_p4)  }
 0x181   : > { %v3409_v19 = vld [vmem:[%s4064_s9 + $0x38] sm:$0xff] (!%p2817_p4)   ;;  %v3410_v20 = vld [vmem:[%s4066_s11] sm:$0xff] (!%p2817_p4)  }
 0x182   : > { %v1675_v23 = vadd.f32 %v1674_v16, %v1644_v14  ;;  %v2034_v24 = vadd.f32 %v2033_v17, %v2003_v15  ;;  %v3404_v14 = vld [vmem:[%s4064_s9 + $0x10] sm:$0xff] (!%p2817_p4)   ;;  %v3405_v15 = vld [vmem:[%s4064_s9 + $0x18] sm:$0xff] (!%p2817_p4)   ;;  %v3406_v16 = vld [vmem:[%s4064_s9 + $0x20] sm:$0xff] (!%p2817_p4)  }
 0x183   : > { %3226 = vmatpush3.bf16.msra.mxu1 (!%p2817_p4), %v3395_v52  ;;  %v3407_v17 = vld [vmem:[%s4064_s9 + $0x28] sm:$0xff] (!%p2817_p4)  }
 0x184   : > { %v1676_v27 = vadd.f32 %v1675_v23, %v1645_v21  ;;  %v2035_v8 = vadd.f32 %v2034_v24, %v2004_v22  ;;  %3227 = vmatprep.subr.bf16.mxu1 (!%p2817_p4), %v3438_v48  ;;  %v3411_v21 = vld [vmem:[%s4066_s11 + $0x8] sm:$0xff] (!%p2817_p4)   ;;  %v3412_v22 = vld [vmem:[%s4066_s11 + $0x10] sm:$0xff] (!%p2817_p4)   ;;  %v3413_v23 = vld [vmem:[%s4066_s11 + $0x18] sm:$0xff] (!%p2817_p4)  }
 0x185   : > { %v3414_v24 = vld [vmem:[%s4066_s11 + $0x20] sm:$0xff] (!%p2817_p4)  }
 0x186   : > { %v1677_v28 = vadd.f32 %v1676_v27, %v1646_v25  ;;  %v2036_v29 = vadd.f32 %v2035_v8, %v2005_v26  ;;  %v3415_v25 = vld [vmem:[%s4066_s11 + $0x28] sm:$0xff] (!%p2817_p4)   ;;  %v3416_v26 = vld [vmem:[%s4066_s11 + $0x30] sm:$0xff] (!%p2817_p4)   ;;  %v2065_v27 = vlaneseq (!%p2817_p4) }
 0x187   : > { %3228 = vmatpush3.bf16.msra.mxu1 (!%p2817_p4), %v3396_v56  ;;  %v2837_v56 = vld [vmem:[%s4062_s7] ss:$0 sm:$0xff] (!%p2817_p4) }
 0x188   : > { %v1678_v30 = vrot.slane %v1677_v28, 4  ;;  %v2037_v31 = vrot.slane %v2036_v29, 4  ;;  %3229 = vmatprep.subr.bf16.mxu1 (!%p2817_p4), %v3438_v48  ;;  %v2066_v8 = vshrl.u32 (!%p2817_p4), %v2065_v27, 7 }
 0x18a   : > { %v1679_v32 = vadd.f32 %v1678_v30, %v1677_v28  ;;  %v2038_v33 = vadd.f32 %v2037_v31, %v2036_v29  ;;  %vm2067_vm5 = vcmp.lt.s32.totalorder (!%p2817_p4), %v2066_v8, 2  ;;  %v2828_v28 = vld [vmem:[%s4061_s6] ss:$0 sm:$0xff] (!%p2817_p4) }
 0x18b   : > { %3230 = vmatpush3.bf16.msra.mxu1 (!%p2817_p4), %v3397_v58  ;;  %v3986_v29 = vsel (!%p2817_p4), %vm2067_vm5, 1.0, %v3438_v48  ;;  %v2838_v58 = vld [vmem:[%s4063_s8] ss:$0 sm:$0xff] (!%p2817_p4) }
 0x18c   : > { %v1680_v35 = vrot.slane %v1679_v32, 2  ;;  %v2039_v36 = vrot.slane %v2038_v33, 2  ;;  %3231 = vmatprep.subr.bf16.mxu1 (!%p2817_p4), %v3438_v48 }
 0x18e   : > { %v1681_v37 = vadd.f32 %v1680_v35, %v1679_v32  ;;  %v2040_v38 = vadd.f32 %v2039_v36, %v2038_v33 }
 0x18f   : > { %3232 = vmatpush3.bf16.msra.mxu1 (!%p2817_p4), %v3398_v61 }
 0x190   : > { %v1682_v39 = vrot.slane %v1681_v37, 1  ;;  %v2041_v40 = vrot.slane %v2040_v38, 1  ;;  %3233 = vmatprep.subr.bf16.mxu1 (!%p2817_p4), %v3438_v48 }
 0x192   : > { %v1683_v41 = vadd.f32 %v1682_v39, %v1681_v37  ;;  %v2042_v42 = vadd.f32 %v2041_v40, %v2040_v38  ;;  %2056 = sbr.rel (%p2817_p4) target bundleno = 1627 (0x65b), region = 92 }
 0x193   : > { %3234 = vmatpush3.bf16.msra.mxu1 (!%p2817_p4), %v3399_v63  ;;  %v3417_v63 = vld [vmem:[%s4066_s11 + $0x38] sm:$0xff] (!%p2817_p4)  }
 0x194   : > { %v1684_v43 = vmul.f32 0.00390625, %v1683_v41  ;;  %v2043_v44 = vmul.f32 0.00390625, %v2042_v42  ;;  %3235 = vmatprep.subr.bf16.mxu1 (!%p2817_p4), %v3438_v48 }
 0x196   : > { %v2047_v45 = vsel %vm2046_vm1, %v3792_v34, %v1684_v43  ;;  %v3387_v34 = vld [vmem:[%s4058_s3 + $0x8] sm:$0xff] (!%p2817_p4)  }
 0x197   : > { %v2049_v46 = vsel %vm2048_vm2, %v2047_v45, %v2043_v44  ;;  %3206 = vmatpush3.bf16.msra.mxu0 (!%p2817_p4), %v3387_v34  ;;  %3236 = vmatpush3.bf16.msra.mxu1 (!%p2817_p4), %v3400_v2 }
 0x198   : > { %2052 = vst [vmem:[%s2051_s0] sm:$0xf] %v2049_v46  ;;  %3207 = vmatprep.subr.bf16.mxu0 (!%p2817_p4), %v3438_v48  ;;  %3237 = vmatprep.subr.bf16.mxu1 (!%p2817_p4), %v3438_v48 }
 0x19b   : > { %3208 = vmatpush3.bf16.msra.mxu0 %v3388_v49  ;;  %3238 = vmatpush3.bf16.msra.mxu1 %v3401_v3 }
 0x19c   : > { %3209 = vmatprep.subr.bf16.mxu0 %v3438_v48  ;;  %3263 = vmatprep.subr.bf16.mxu1 %v3438_v48 }
 0x19f   : > { %v2059_v53 = vld [vmem:[#allocation2 + $0x4] sm:$0xf]  ;;  %3210 = vmatpush3.bf16.msra.mxu0 %v3389_v51  ;;  %v2057_v60 = vld [vmem:[#allocation2] sm:$0xf] }
 0x1a0   : > { %3211 = vmatprep.subr.bf16.mxu0 %v3438_v48  ;;  %v2061_v55 = vrot.slane %v2059_v53, 4 }
 0x1a2   : > { %v2064_v0 = vsel %vm2063_vm4, %v2057_v60, %v2061_v55 }
 0x1a3   : > { %3212 = vmatpush3.bf16.msra.mxu0 %v3390_v54  ;;  %v2070_v1 = vpack.c.bf16 %v2064_v0, %v2064_v0  ;;  %v2839_v0 = vld [vmem:[%s4065_s10] ss:$0 sm:$0xff] }
 0x1a4   : > { %3213 = vmatprep.subr.bf16.mxu0 %v3438_v48 }
 0x1a7   : > { %3214 = vmatpush3.bf16.msra.mxu0 %v3391_v57 }
 0x1a8   : > { %3215 = vmatprep.subr.bf16.mxu0 %v3438_v48 }
 0x1ab   : > { %3216 = vmatpush3.bf16.msra.mxu0 %v3392_v59 }
 0x1ac   : > { %3217 = vmatprep.subr.bf16.mxu0 %v3438_v48 }
 0x1af   : > { %3218 = vmatpush3.bf16.msra.mxu0 %v3393_v62 }
 0x1b0   : > { %3243 = vmatprep.subr.bf16.mxu0 %v3438_v48 }
 0x1b2   : > { %3220 = vmatmul.mubr.bf16.vlgmr.msra.gmra.mrb[0].mxu0 %v2070_v1 }
 0x1b3   : > { %3259 = vmatprep.mubr.msk.bf16.mxu0 %vm3439_vm3, %v3438_v48  ;;  %3244 = vmatpush3.bf16.msra.mxu0 %v3402_v12  ;;  %v3422_v12 = vld [vmem:[%s4070_s15 + $0x20] sm:$0xff]  }
 0x1b4   : > { %3245 = vmatprep.subr.bf16.mxu0 %v3438_v48 }
 0x1b7   : > { %3246 = vmatpush3.bf16.msra.mxu0 %v3403_v13  ;;  %v3423_v13 = vld [vmem:[%s4070_s15 + $0x28] sm:$0xff]  }
 0x1b8   : > { %3247 = vmatprep.subr.bf16.mxu0 %v3438_v48 }
 0x1bb   : > { %3248 = vmatpush3.bf16.msra.mxu0 %v3404_v14  ;;  %v3424_v14 = vld [vmem:[%s4070_s15 + $0x30] sm:$0xff]  }
 0x1bc   : > { %3249 = vmatprep.subr.bf16.mxu0 %v3438_v48 }
 0x1bf   : > { %3250 = vmatpush3.bf16.msra.mxu0 %v3405_v15  ;;  %v3425_v15 = vld [vmem:[%s4070_s15 + $0x38] sm:$0xff]  }
 0x1c0   : > { %3251 = vmatprep.subr.bf16.mxu0 %v3438_v48 }
 0x1c3   : > { %3252 = vmatpush3.bf16.msra.mxu0 %v3406_v16  ;;  %v2848_v16 = vld [vmem:[%s4067_s12] ss:$0 sm:$0xff] }
 0x1c4   : > { %3253 = vmatprep.subr.bf16.mxu0 %v3438_v48 }
 0x1c7   : > { %3254 = vmatpush3.bf16.msra.mxu0 %v3407_v17 }
 0x1c8   : > { %3255 = vmatprep.subr.bf16.mxu0 %v3438_v48 }
 0x1cb   : > { %3256 = vmatpush3.bf16.msra.mxu0 %v3408_v18 }
 0x1cc   : > { %3257 = vmatprep.subr.bf16.mxu0 %v3438_v48 }
 0x1cf   : > { %3258 = vmatpush3.bf16.msra.mxu0 %v3409_v19 }
 0x1d0   : > { %3283 = vmatprep.subr.bf16.mxu0 %v3438_v48 }
 0x285   : > { %v2176_v5 = vpop.f32.mrb[0].mxu0 }
 0x286   : > { %v2177_v6 = vadd.f32 %v2819_v4, %v2176_v5  ;;  %v3221_v7 = vpop.f32.mrb[1].mxu0 }
 0x287   : > { %v2179_v9 = vpop.f32.mrb[2].mxu0  ;;  %v3418_v7 = vld [vmem:[%s4070_s15] sm:$0xff]  }
 0x288   : > { %v2182_v10 = vpack.c.bf16 %v2177_v6, %v2177_v6  ;;  %v3222_v11 = vpop.f32.mrb[3].mxu0  ;;  %v3419_v9 = vld [vmem:[%s4070_s15 + $0x8] sm:$0xff]  }
 0x289   : > { %v3421_v11 = vld [vmem:[%s4070_s15 + $0x18] sm:$0xff]  }
 0x28a   : > { %3240 = vmatmul.mubr.bf16.vlgmr.msra.gmra.mrb[0].mxu1 %v2182_v10  ;;  %v3420_v10 = vld [vmem:[%s4070_s15 + $0x10] sm:$0xff]  }
 0x28b   : > { %3279 = vmatprep.mubr.msk.bf16.mxu1 %vm3439_vm3, %v3438_v48  ;;  %3264 = vmatpush3.bf16.msra.mxu1 %v3410_v20 }
 0x28c   : > { %3265 = vmatprep.subr.bf16.mxu1 %v3438_v48 }
 0x28f   : > { %3266 = vmatpush3.bf16.msra.mxu1 %v3411_v21 }
 0x290   : > { %3267 = vmatprep.subr.bf16.mxu1 %v3438_v48 }
 0x293   : > { %3268 = vmatpush3.bf16.msra.mxu1 %v3412_v22 }
 0x294   : > { %3269 = vmatprep.subr.bf16.mxu1 %v3438_v48 }
 0x297   : > { %3270 = vmatpush3.bf16.msra.mxu1 %v3413_v23 }
 0x298   : > { %3271 = vmatprep.subr.bf16.mxu1 %v3438_v48 }
 0x29b   : > { %3272 = vmatpush3.bf16.msra.mxu1 %v3414_v24 }
 0x29c   : > { %3273 = vmatprep.subr.bf16.mxu1 %v3438_v48 }
 0x29f   : > { %3274 = vmatpush3.bf16.msra.mxu1 %v3415_v25 }
 0x2a0   : > { %3275 = vmatprep.subr.bf16.mxu1 %v3438_v48 }
 0x2a3   : > { %3276 = vmatpush3.bf16.msra.mxu1 %v3416_v26 }
 0x2a4   : > { %3277 = vmatprep.subr.bf16.mxu1 %v3438_v48 }
 0x2a7   : > { %3278 = vmatpush3.bf16.msra.mxu1 %v3417_v63 }
 0x35d   : > { %v2288_v30 = vpop.f32.mrb[0].mxu1 }
 0x35e   : > { %v2289_v31 = vadd.f32 %v2828_v28, %v2288_v30  ;;  %v3241_v32 = vpop.f32.mrb[1].mxu1 }
 0x35f   : > { %v2291_v33 = vpop.f32.mrb[2].mxu1 }
 0x360   : > { %v2294_v35 = vmul.f32 %v3986_v29, %v2289_v31  ;;  %v3242_v36 = vpop.f32.mrb[3].mxu1 }
 0x362   : > { %v2295_v37 = vrot.slane %v2294_v35, 4 }
 0x364   : > { %v2296_v38 = vadd.f32 %v2295_v37, %v2294_v35 }
 0x366   : > { %v2297_v39 = vrot.slane %v2296_v38, 2 }
 0x368   : > { %v2298_v40 = vadd.f32 %v2297_v39, %v2296_v38 }
 0x36a   : > { %v2299_v41 = vrot.slane %v2298_v40, 1 }
 0x36c   : > { %v2300_v42 = vadd.f32 %v2299_v41, %v2298_v40 }
 0x36e   : > { %v2301_v43 = vmul.f32 0.5, %v2300_v42  ;;  %v2857_v42 = vld [vmem:[%s4068_s13] ss:$0 sm:$0xff] }
 0x370   : > { %v2302_v44 = vsub.f32 %v2289_v31, %v2301_v43 }
 0x372   : > { %v2303_v45 = vmul.f32 %v2302_v44, %v2302_v44 }
 0x374   : > { %v2304_v46 = vmul.f32 %v3986_v29, %v2303_v45 }
 0x376   : > { %v2305_v47 = vrot.slane %v2304_v46, 4 }
 0x378   : > { %v2306_v34 = vadd.f32 %v2305_v47, %v2304_v46 }
 0x37a   : > { %v2307_v49 = vrot.slane %v2306_v34, 2 }
 0x37c   : > { %v2308_v50 = vadd.f32 %v2307_v49, %v2306_v34  ;;  %v2859_v34 = vld [vmem:[%s4071_s16] ss:$0 sm:$0xff] }
 0x37e   : > { %v2309_v51 = vrot.slane %v2308_v50, 1 }
 0x380   : > { %v2310_v52 = vadd.f32 %v2309_v51, %v2308_v50 }
 0x382   : > { %v2311_v53 = vmul.f32 0.5, %v2310_v52 }
 0x384   : > { %v2312_v54 = vadd.f32 1e-05, %v2311_v53 }
 0x386   : > { %3426 = vrsqrt.f32 %v2312_v54 }
 0x390   : > { %v3427_v55 = vpop.eup %3426 }
 0x391   : > { %v2314_v57 = vmul.f32 %v3427_v55, %v2302_v44  ;;  %v2858_v44 = vld [vmem:[%s4069_s14] ss:$0 sm:$0xff] }
 0x393   : > { %v2322_v59 = vmul.f32 %v2837_v56, %v2314_v57 }
 0x395   : > { %v2330_v60 = vadd.f32 %v2838_v58, %v2322_v59 }
 0x397   : > { %v2331_v61 = vmax.f32 %v2330_v60, 0.0 }
 0x399   : > { %v2332_v62 = vpack.c.bf16 %v2331_v61, %v2331_v61 }
 0x39b   : > { %3260 = vmatmul.mubr.bf16.vlgmr.msra.gmra.mrb[4].mxu0 %v2332_v62 }
 0x39c   : > { %3299 = vmatprep.mubr.msk.bf16.mxu0 %vm3439_vm3, %v3438_v48  ;;  %3284 = vmatpush3.bf16.msra.mxu0 %v3418_v7 }
 0x39d   : > { %3285 = vmatprep.subr.bf16.mxu0 %v3438_v48 }
 0x3a0   : > { %3286 = vmatpush3.bf16.msra.mxu0 %v3419_v9 }
 0x3a1   : > { %3287 = vmatprep.subr.bf16.mxu0 %v3438_v48 }
 0x3a4   : > { %3288 = vmatpush3.bf16.msra.mxu0 %v3420_v10 }
 0x3a5   : > { %3289 = vmatprep.subr.bf16.mxu0 %v3438_v48 }
 0x3a8   : > { %3290 = vmatpush3.bf16.msra.mxu0 %v3421_v11 }
 0x3a9   : > { %3291 = vmatprep.subr.bf16.mxu0 %v3438_v48 }
 0x3ac   : > { %3292 = vmatpush3.bf16.msra.mxu0 %v3422_v12 }
 0x3ad   : > { %3293 = vmatprep.subr.bf16.mxu0 %v3438_v48 }
 0x3b0   : > { %3294 = vmatpush3.bf16.msra.mxu0 %v3423_v13 }
 0x3b1   : > { %3295 = vmatprep.subr.bf16.mxu0 %v3438_v48 }
 0x3b4   : > { %3296 = vmatpush3.bf16.msra.mxu0 %v3424_v14 }
 0x3b5   : > { %3297 = vmatprep.subr.bf16.mxu0 %v3438_v48 }
 0x3b8   : > { %3298 = vmatpush3.bf16.msra.mxu0 %v3425_v15 }
 0x46e   : > { %v2438_v1 = vpop.f32.mrb[4].mxu0 }
 0x46f   : > { %v2439_v2 = vadd.f32 %v2839_v0, %v2438_v1  ;;  %v3261_v3 = vpop.f32.mrb[5].mxu0 }
 0x470   : > { %v2441_v4 = vpop.f32.mrb[6].mxu0 }
 0x471   : > { %v2444_v5 = vpack.c.bf16 %v2439_v2, %v2439_v2  ;;  %v3262_v6 = vpop.f32.mrb[7].mxu0 }
 0x473   : > { %3280 = vmatmul.mubr.bf16.vlgmr.msra.gmra.mrb[4].mxu1 %v2444_v5 }
 0x546   : > { %v2550_v17 = vpop.f32.mrb[4].mxu1 }
 0x547   : > { %v2551_v18 = vadd.f32 %v2848_v16, %v2550_v17  ;;  %v3281_v19 = vpop.f32.mrb[5].mxu1 }
 0x548   : > { %v2553_v20 = vpop.f32.mrb[6].mxu1 }
 0x549   : > { %v2556_v21 = vmul.f32 %v3986_v29, %v2551_v18  ;;  %v3282_v22 = vpop.f32.mrb[7].mxu1 }
 0x54b   : > { %v2557_v23 = vrot.slane %v2556_v21, 4 }
 0x54d   : > { %v2558_v24 = vadd.f32 %v2557_v23, %v2556_v21 }
 0x54f   : > { %v2559_v25 = vrot.slane %v2558_v24, 2 }
 0x551   : > { %v2560_v26 = vadd.f32 %v2559_v25, %v2558_v24 }
 0x553   : > { %v2561_v27 = vrot.slane %v2560_v26, 1 }
 0x555   : > { %v2562_v8 = vadd.f32 %v2561_v27, %v2560_v26 }
 0x557   : > { %v2563_v28 = vmul.f32 0.5, %v2562_v8 }
 0x559   : > { %v2564_v48 = vsub.f32 %v2551_v18, %v2563_v28 }
 0x55b   : > { %v2565_v30 = vmul.f32 %v2564_v48, %v2564_v48 }
 0x55d   : > { %v2566_v31 = vmul.f32 %v3986_v29, %v2565_v30 }
 0x55f   : > { %v2567_v32 = vrot.slane %v2566_v31, 4 }
 0x561   : > { %v2568_v33 = vadd.f32 %v2567_v32, %v2566_v31 }
 0x563   : > { %v2569_v35 = vrot.slane %v2568_v33, 2 }
 0x565   : > { %v2570_v36 = vadd.f32 %v2569_v35, %v2568_v33 }
 0x567   : > { %v2571_v37 = vrot.slane %v2570_v36, 1 }
 0x569   : > { %v2572_v38 = vadd.f32 %v2571_v37, %v2570_v36 }
 0x56b   : > { %v2573_v39 = vmul.f32 0.5, %v2572_v38 }
 0x56d   : > { %v2574_v40 = vadd.f32 1e-05, %v2573_v39 }
 0x56f   : > { %3428 = vrsqrt.f32 %v2574_v40 }
 0x579   : > { %v3429_v41 = vpop.eup %3428 }
 0x57a   : > { %v2576_v43 = vmul.f32 %v3429_v41, %v2564_v48 }
 0x57c   : > { %v2584_v29 = vmul.f32 %v2857_v42, %v2576_v43 }
 0x57e   : > { %v2592_v45 = vadd.f32 %v2858_v44, %v2584_v29 }
 0x580   : > { %v2593_v46 = vmax.f32 %v2592_v45, 0.0 }
 0x582   : > { %v2594_v47 = vpack.c.bf16 %v2593_v46, %v2593_v46 }
 0x584   : > { %3300 = vmatmul.mubr.bf16.vlgmr.msra.gmra.mrb[8].mxu0 %v2594_v47 }
 0x657   : > { %v2700_v49 = vpop.f32.mrb[8].mxu0 }
 0x658   : > { %v2701_v50 = vadd.f32 %v2859_v34, %v2700_v49  ;;  %v3301_v51 = vpop.f32.mrb[9].mxu0 }
 0x659   : > { %v2703_v52 = vpop.f32.mrb[10].mxu0 }
 0x65a   : > { %2706 = vst [vmem:[%s4072_s17] sm:$0xff] %v2701_v50  ;;  %v3302_v53 = vpop.f32.mrb[11].mxu0 }
 0x65b PF: > { %s27_s24 = sadd.s32 1, %s3436_s24  }
 0x65c   : > { %p24_p5 = scmp.ge.s32.totalorder %s27_s24, 4  }
 0x65e   :  { %26 = sbr.rel (!%p24_p5) target bundleno = 3 (0x3), region = 120 }

</bundles_post_ra>
